<compile_context>
chip_gen: v5e
topology: v5e:2x2
jax: 0.10.0
libtpu: 0.0.40
codegen_flags: <defaults>
</compile_context>

<pallas_src>
import functools
import math

import jax
import jax.numpy as jnp
from jax import lax
from jax.experimental import pallas as pl
from jax.experimental.pallas import tpu as pltpu

LANE = 128  # lane-dense output width (TPU vreg lane count)


def _round_up(x, m):
    return ((x + m - 1) // m) * m


def _bf16_vpu_available():
    """bf16 elementwise/transcendental support: v6e / v7x yes, v2-v5 no."""
    try:
        kind = jax.devices()[0].device_kind.lower()
    except Exception:
        return False
    return not any(tag in kind for tag in ("v2", "v3", "v4", "v5"))


def _mlp_kernel(x_ref, w1_ref, b1_ref, w2_ref, b2_ref, o_ref, *, num_out,
                bf16_epilogue):
    # x tile: (TM, num_inp) f32 (cast to bf16 in VMEM); w1/w2 bf16, VMEM-resident
    # across the grid; b1/b2 f32; output tile (TM, OUT_PAD) f32, lane-dense.

    # Layer 1: bf16 MXU matmul, f32 accumulation.
    x = x_ref[...].astype(jnp.bfloat16)
    h = jnp.dot(x, w1_ref[...], preferred_element_type=jnp.float32)
    h = h + b1_ref[...]
    if bf16_epilogue:
        # v6e/v7x: bf16 EUP tanh (halves EUP pushes); h goes to bf16 for the
        # second matmul anyway, so no extra precision lost at the MXU input.
        h = jnp.tanh(h.astype(jnp.bfloat16))
    else:
        # v5e and older: no bf16 VPU/EUP -> keep tanh in f32, then cast.
        h = jnp.tanh(h).astype(jnp.bfloat16)

    # Layer 2: lane-dense (num_hid x 128) padded matmul, bf16 inputs, f32 acc.
    y = jnp.dot(h, w2_ref[...], preferred_element_type=jnp.float32)
    y = jnp.tanh(y + b2_ref[...])

    # Exclude padded output columns from the softmax reductions.
    col = lax.broadcasted_iota(jnp.int32, y.shape, 1)
    y = jnp.where(col < num_out, y, jnp.float32(-1e30))

    # Numerically stable log_softmax over the (masked) 128-lane tile.
    m = jnp.max(y, axis=1, keepdims=True)
    z = y - m
    lse = jnp.log(jnp.sum(jnp.exp(z), axis=1, keepdims=True))
    o_ref[...] = (z - lse).astype(o_ref.dtype)


def prepare_params(w1, b1, w2, b2):
    """One-time weight prep (hoisted out of the per-call hot path):
    bf16 cast of w1/w2 and lane-dense zero-padding of w2/b2 to 128 columns."""
    num_inp, num_hid = w1.shape
    num_hid2, num_out = w2.shape
    assert num_hid == num_hid2 and b1.shape == (1, num_hid) and b2.shape == (1, num_out)
    out_pad = _round_up(num_out, LANE)
    w1_bf = w1.astype(jnp.bfloat16)
    w2p = (jnp.zeros((num_hid, out_pad), jnp.bfloat16)
           .at[:, :num_out].set(w2.astype(jnp.bfloat16)))
    b2p = (jnp.zeros((1, out_pad), jnp.float32)
           .at[:, :num_out].set(b2.astype(jnp.float32)))
    return (w1_bf, b1.astype(jnp.float32), w2p, b2p, num_out)


def mnist_fc_forward(x, prepped_params, *, tm=512, bf16_epilogue=None,
                     return_padded=False):
    """x: (B, num_inp) f32; prepped_params: output of prepare_params().
    Returns (B, num_out) f32 log-probs (or the padded lane-dense buffer if
    return_padded=True; padded columns then hold ~-1e30 sentinels)."""
    w1_bf, b1, w2p, b2p, num_out = prepped_params
    B, num_inp = x.shape
    num_hid = w1_bf.shape[1]
    out_pad = w2p.shape[1]
    assert w1_bf.shape == (num_inp, num_hid)

    if bf16_epilogue is None:
        bf16_epilogue = _bf16_vpu_available()

    # Batch tiling: multiple of 16 sublanes (bf16 vreg packing); clamp to B.
    tm = max(16, min(_round_up(tm, 16), _round_up(B, 16)))
    grid_m = pl.cdiv(B, tm)
    b_pad = grid_m * tm
    if b_pad != B:
        x = jnp.pad(x, ((0, b_pad - B), (0, 0)))

    cost = pl.CostEstimate(
        flops=2 * b_pad * (num_inp * num_hid + num_hid * out_pad),
        transcendentals=b_pad * (num_hid + 2 * out_pad),  # tanh, tanh, exp
        bytes_accessed=(b_pad * num_inp * 4 + w1_bf.size * 2 + w2p.size * 2
                        + b1.size * 4 + b2p.size * 4 + b_pad * out_pad * 4),
    )

    kernel = functools.partial(_mlp_kernel, num_out=num_out,
                               bf16_epilogue=bf16_epilogue)
    out = pl.pallas_call(
        kernel,
        out_shape=jax.ShapeDtypeStruct((b_pad, out_pad), jnp.float32),
        grid=(grid_m,),
        in_specs=[
            pl.BlockSpec((tm, num_inp), lambda i: (i, 0)),       # x: tiled over batch
            pl.BlockSpec((num_inp, num_hid), lambda i: (0, 0)),  # w1: VMEM-resident
            pl.BlockSpec((1, num_hid), lambda i: (0, 0)),        # b1: resident
            pl.BlockSpec((num_hid, out_pad), lambda i: (0, 0)),  # w2 (padded): resident
            pl.BlockSpec((1, out_pad), lambda i: (0, 0)),        # b2 (padded): resident
        ],
        out_specs=pl.BlockSpec((tm, out_pad), lambda i: (i, 0)),
        compiler_params=pltpu.CompilerParams(dimension_semantics=("parallel",)),
        cost_estimate=cost,
    )(x, w1_bf, b1, w2p, b2p)

    if return_padded:
        return out
    # Lane-sparse slice kept out of the kernel path; skip via return_padded=True
    # when the consumer (e.g. NLL gather) can index the padded buffer directly.
    return out[:B, :num_out]


def init_params(key, num_inp, num_hid, num_out):
    """Deterministic init mimicking nn.Linear defaults (kaiming_uniform a=sqrt(5))."""
    k1, k2, k3, k4 = jax.random.split(key, 4)
    bound1 = 1.0 / math.sqrt(num_inp)
    bound2 = 1.0 / math.sqrt(num_hid)
    # Stored transposed relative to torch: (in, out).
    w1 = jax.random.uniform(k1, (num_inp, num_hid), jnp.float32, -bound1, bound1)
    b1 = jax.random.uniform(k2, (1, num_hid), jnp.float32, -bound1, bound1)
    w2 = jax.random.uniform(k3, (num_hid, num_out), jnp.float32, -bound2, bound2)
    b2 = jax.random.uniform(k4, (1, num_out), jnp.float32, -bound2, bound2)
    return w1, b1, w2, b2


def reference_forward_f32(x, w1, b1, w2, b2):
    h = jnp.tanh(x @ w1 + b1)
    y = jnp.tanh(h @ w2 + b2)
    return jax.nn.log_softmax(y, axis=1)


def reference_forward_emulated(x, w1, b1, w2, b2, bf16_epilogue):
    # Mirrors the kernel's bf16-matmul / f32-accumulate arithmetic for a tight check.
    h = jnp.dot(x.astype(jnp.bfloat16), w1.astype(jnp.bfloat16),
                preferred_element_type=jnp.float32)
    h = h + b1
    if bf16_epilogue:
        h = jnp.tanh(h.astype(jnp.bfloat16))
    else:
        h = jnp.tanh(h).astype(jnp.bfloat16)
    y = jnp.dot(h, w2.astype(jnp.bfloat16), preferred_element_type=jnp.float32)
    y = jnp.tanh(y + b2)
    return jax.nn.log_softmax(y, axis=1)


if __name__ == "__main__":
    # Small shapes consistent with the module (Linear -> tanh -> Linear -> tanh -> log_softmax).
    B, num_inp, num_hid, num_out = 256, 256, 128, 10

    key = jax.random.PRNGKey(0)
    kx, kp = jax.random.split(key)
    x = jax.random.normal(kx, (B, num_inp), jnp.float32)
    w1, b1, w2, b2 = init_params(kp, num_inp, num_hid, num_out)

    # One-time param prep (bf16 casts + lane-dense padding), outside the hot path.
    prepped = prepare_params(w1, b1, w2, b2)

    out = mnist_fc_forward(x, prepped, tm=512)   # B=256 -> tm=256, grid=1
    out = jax.block_until_ready(out)
    assert out.shape == (B, num_out)

    # Check vs. a reference that mirrors the kernel's bf16/f32 arithmetic.
    used_bf16_ep = _bf16_vpu_available()
    ref_emul = reference_forward_emulated(x, w1, b1, w2, b2, used_bf16_ep)
    assert jnp.allclose(out, ref_emul, atol=2e-2, rtol=2e-2), \
        "mismatch vs bf16-emulated reference"

    # Loose check vs. the pure-f32 reference (bf16 matmul inputs -> ~1e-2 level diffs).
    ref_f32 = reference_forward_f32(x, w1, b1, w2, b2)
    assert jnp.allclose(out, ref_f32, atol=5e-2, rtol=5e-2), \
        "mismatch vs f32 reference"

    print("KERNEL_OK")
</pallas_src>

<mosaic_0001>
module attributes {stable_mosaic.version = 11 : i64} {
  func.func @_mlp_kernel(%arg0: i32, %arg1: memref<256x256xf32, #tpu.memory_space<vmem>>, %arg2: memref<256x128xbf16, #tpu.memory_space<vmem>>, %arg3: memref<1x128xf32, #tpu.memory_space<vmem>>, %arg4: memref<128x128xbf16, #tpu.memory_space<vmem>>, %arg5: memref<1x128xf32, #tpu.memory_space<vmem>>, %arg6: memref<256x128xf32, #tpu.memory_space<vmem>>) attributes {dimension_semantics = [#tpu.dimension_semantics<parallel>], iteration_bounds = array<i64: 1>, scalar_prefetch = 0 : i64, scratch_operands = 0 : i64, tpu.core_type = #tpu.core_type<tc>, window_params = [{transform_indices = @transform_0, window_bounds = array<i64: 256, 256>}, {pipeline_mode = #tpu.pipeline_mode<synchronous>, transform_indices = @transform_1, window_bounds = array<i64: 256, 128>}, {pipeline_mode = #tpu.pipeline_mode<synchronous>, transform_indices = @transform_2, window_bounds = array<i64: 1, 128>}, {pipeline_mode = #tpu.pipeline_mode<synchronous>, transform_indices = @transform_3, window_bounds = array<i64: 128, 128>}, {pipeline_mode = #tpu.pipeline_mode<synchronous>, transform_indices = @transform_4, window_bounds = array<i64: 1, 128>}, {transform_indices = @transform_5, window_bounds = array<i64: 256, 128>}]} {
    %c0 = arith.constant 0 : index
    %c0_0 = arith.constant 0 : index
    %0 = vector.load %arg1[%c0, %c0_0] : memref<256x256xf32, #tpu.memory_space<vmem>>, vector<256x256xf32>
    %1 = arith.truncf %0 : vector<256x256xf32> to vector<256x256xbf16>
    %c0_1 = arith.constant 0 : index
    %c0_2 = arith.constant 0 : index
    %2 = vector.load %arg2[%c0_1, %c0_2] : memref<256x128xbf16, #tpu.memory_space<vmem>>, vector<256x128xbf16>
    %cst = arith.constant dense<0.000000e+00> : vector<256x128xf32>
    %3 = tpu.matmul %1, %2, %cst {dimension_numbers = #tpu.dot_dimension_numbers<[1], [0], [0], [1], [0, 0, 1, 1], [], []>} : vector<256x256xbf16>, vector<256x128xbf16>, vector<256x128xf32> -> vector<256x128xf32>
    %c0_3 = arith.constant 0 : index
    %c0_4 = arith.constant 0 : index
    %4 = vector.load %arg3[%c0_3, %c0_4] : memref<1x128xf32, #tpu.memory_space<vmem>>, vector<1x128xf32>
    %5 = vector.broadcast %4 : vector<1x128xf32> to vector<256x128xf32>
    %6 = arith.addf %3, %5 : vector<256x128xf32>
    %7 = arith.truncf %6 : vector<256x128xf32> to vector<256x128xbf16>
    %8 = math.tanh %7 : vector<256x128xbf16>
    %c0_5 = arith.constant 0 : index
    %c0_6 = arith.constant 0 : index
    %9 = vector.load %arg4[%c0_5, %c0_6] : memref<128x128xbf16, #tpu.memory_space<vmem>>, vector<128x128xbf16>
    %cst_7 = arith.constant dense<0.000000e+00> : vector<256x128xf32>
    %10 = tpu.matmul %8, %9, %cst_7 {dimension_numbers = #tpu.dot_dimension_numbers<[1], [0], [0], [1], [0, 0, 1, 1], [], []>} : vector<256x128xbf16>, vector<128x128xbf16>, vector<256x128xf32> -> vector<256x128xf32>
    %c0_8 = arith.constant 0 : index
    %c0_9 = arith.constant 0 : index
    %11 = vector.load %arg5[%c0_8, %c0_9] : memref<1x128xf32, #tpu.memory_space<vmem>>, vector<1x128xf32>
    %12 = vector.broadcast %11 : vector<1x128xf32> to vector<256x128xf32>
    %13 = arith.addf %10, %12 : vector<256x128xf32>
    %14 = math.tanh %13 : vector<256x128xf32>
    %15 = tpu.iota {dimensions = array<i32: 1>} : vector<256x128xi32>
    %c10_i32 = arith.constant 10 : i32
    %16 = vector.broadcast %c10_i32 : i32 to vector<256x128xi32>
    %17 = arith.cmpi slt, %15, %16 : vector<256x128xi32>
    %cst_10 = arith.constant -1.000000e+30 : f32
    %18 = vector.broadcast %cst_10 : f32 to vector<256x128xf32>
    %19 = arith.select %17, %14, %18 : vector<256x128xi1>, vector<256x128xf32>
    %cst_11 = arith.constant dense<0xFF800000> : vector<256xf32>
    %20 = vector.multi_reduction <maximumf>, %19, %cst_11 [1] : vector<256x128xf32> to vector<256xf32>
    %21 = vector.shape_cast %20 : vector<256xf32> to vector<256x1xf32>
    %22 = vector.broadcast %21 : vector<256x1xf32> to vector<256x128xf32>
    %23 = arith.subf %19, %22 : vector<256x128xf32>
    %24 = math.exp %23 : vector<256x128xf32>
    %cst_12 = arith.constant dense<0.000000e+00> : vector<256xf32>
    %25 = vector.multi_reduction <add>, %24, %cst_12 [1] : vector<256x128xf32> to vector<256xf32>
    %26 = vector.shape_cast %25 : vector<256xf32> to vector<256x1xf32>
    %27 = math.log %26 : vector<256x1xf32>
    %28 = vector.broadcast %27 : vector<256x1xf32> to vector<256x128xf32>
    %29 = arith.subf %23, %28 : vector<256x128xf32>
    %c0_13 = arith.constant 0 : index
    %c0_14 = arith.constant 0 : index
    %30 = vector.load %arg6[%c0_13, %c0_14] : memref<256x128xf32, #tpu.memory_space<vmem>>, vector<256x128xf32>
    tpu.vector_store %arg6[%c0_13, %c0_14], %29 {strides = array<i32>} : memref<256x128xf32, #tpu.memory_space<vmem>>, vector<256x128xf32>,
    return
  }
  func.func @transform_0(%arg0: i32) -> (i32, i32) {
    %c0_i32 = arith.constant 0 : i32
    %c0_i32_0 = arith.constant 0 : i32
    return %arg0, %c0_i32 : i32, i32
  }
  func.func @transform_1(%arg0: i32) -> (i32, i32) {
    %c0_i32 = arith.constant 0 : i32
    %c0_i32_0 = arith.constant 0 : i32
    %c0_i32_1 = arith.constant 0 : i32
    return %c0_i32, %c0_i32_0 : i32, i32
  }
  func.func @transform_2(%arg0: i32) -> (i32, i32) {
    %c0_i32 = arith.constant 0 : i32
    %c0_i32_0 = arith.constant 0 : i32
    %c0_i32_1 = arith.constant 0 : i32
    return %c0_i32, %c0_i32_0 : i32, i32
  }
  func.func @transform_3(%arg0: i32) -> (i32, i32) {
    %c0_i32 = arith.constant 0 : i32
    %c0_i32_0 = arith.constant 0 : i32
    %c0_i32_1 = arith.constant 0 : i32
    return %c0_i32, %c0_i32_0 : i32, i32
  }
  func.func @transform_4(%arg0: i32) -> (i32, i32) {
    %c0_i32 = arith.constant 0 : i32
    %c0_i32_0 = arith.constant 0 : i32
    %c0_i32_1 = arith.constant 0 : i32
    return %c0_i32, %c0_i32_0 : i32, i32
  }
  func.func @transform_5(%arg0: i32) -> (i32, i32) {
    %c0_i32 = arith.constant 0 : i32
    %c0_i32_0 = arith.constant 0 : i32
    return %arg0, %c0_i32 : i32, i32
  }
}

</mosaic_0001>

<bundles_post_ra>
// kernel: tpu_custom_call.1
= control target key start
LH: loop header
LB: loop body
LE: loop exit
PB: predicated region body
PF: predicated region fallthrough
CT: control target
= control target key end

     0   :  { %10 = vsyncpa [#allocation3], 0  ;;  %s2162_s0 = inlined_call_operand.hbm [shape: f32[256,256], index: 0, kind: input, shape index: {}]   ;;  %s2163_s1 = inlined_call_operand.hbm [shape: bf16[256,128], index: 1, kind: input, shape index: {}]   ;;  %s2164_s2 = inlined_call_operand.vmem [shape: f32[1,128], index: 2, kind: input, shape index: {}]   ;;  %s2165_s3 = inlined_call_operand.hbm [shape: bf16[128,128], index: 3, kind: input, shape index: {}]   ;;  %s2166_s4 = inlined_call_operand.vmem [shape: f32[1,128], index: 4, kind: input, shape index: {}]   ;;  %s2167_s5 = inlined_call_operand.hbm [shape: f32[256,128], index: 5, kind: output, shape index: {}]  }
   0x1   :  { %11 = vsyncpa [#allocation6], 0  ;;  %s30_s20 = sshll.u32 %s2163_s1, 4  ;;  %s31_s20 = int_to_ptr.hbm [resolvable:$true] %s30_s20 }
   0x2   :  { %12 = vsyncpa [#allocation4], 0  ;;  %s1680_s21 = smov [#allocation5]   ;;  %s17_s25 = sshll.u32 %s2162_s0, 4  ;;  %s18_s25 = int_to_ptr.hbm [resolvable:$true] %s17_s25 }
   0x3   :  { %s32_s22 = sshll.u32 %s1680_s21, 4  ;;  %s1681_s26 = smov 64   ;;  %s33_s22 = int_to_ptr.vmem [resolvable:$true] %s32_s22 }
   0x4   :  { %s1682_s27 = smov 4   ;;  %s1683_s28 = smov [#allocation2]  }
   0x5   :  { %38 = dma.hbm_to_vmem [thread:$0]  %s31_s20, 2048, %s33_s22, [#allocation6], %s1681_s26, %s1681_s26, %s1682_s27  }
   0x6   :  { %s19_s29 = sshll.u32 %s1683_s28, 4  ;;  %s1684_s30 = smov 256   ;;  %s20_s29 = int_to_ptr.vmem [resolvable:$true] %s19_s29 }
   0x7   :  { %s1685_s6 = smov 16   ;;  %s45_s8 = sshll.u32 %s2165_s3, 4  ;;  %s46_s8 = int_to_ptr.hbm [resolvable:$true] %s45_s8 }
   0x8   :  { %25 = dma.hbm_to_vmem [thread:$0]  %s18_s25, 8192, %s20_s29, [#allocation3], %s1684_s30, %s1684_s30, %s1685_s6  }
   0x9   :  { %s1686_s9 = smov [#allocation7]  }
   0xa   :  { %s47_s10 = sshll.u32 %s1686_s9, 4  ;;  %s48_s10 = int_to_ptr.vmem [resolvable:$true] %s47_s10 }
   0xb   :  { %53 = dma.hbm_to_vmem [thread:$0]  %s46_s8, 1024, %s48_s10, [#allocation6], %s1681_s26, %s1681_s26, %s1682_s27  }
   0xc   :  { %1674 = dma.done.wait [#allocation3], 8192  }
   0xd   :  { %1675 = vsyncadd [#allocation3], 4294959104 }
   0xe   :  { %1676 = dma.done.wait [#allocation6], 3072  }
   0xf   :  { %1677 = vsyncadd [#allocation6], 4294964224  ;;  %v1269_v0 = vld [vmem:[#allocation5 + $0x38] sm:$0xff]  ;;  %v1268_v2 = vld [vmem:[#allocation5 + $0x30] sm:$0xff]  ;;  %s1152_s15 = sshll.u32 %s2167_s5, 4  ;;  %s1688_s16 = smov 128   ;;  %s1153_s15 = int_to_ptr.hbm [resolvable:$true] %s1152_s15 }
  0x10   :  { %v1277_v1 = vld [vmem:[#allocation5 + $0x78] sm:$0xff]  ;;  %296 = vmatpush.bf16.msra.mxu0 %v1269_v0  ;;  %1286 = vmatpush.bf16.msra.mxu3 %v1269_v0  ;;  %v1276_v3 = vld [vmem:[#allocation5 + $0x70] sm:$0xff]  ;;  %v1267_v4 = vld [vmem:[#allocation5 + $0x28] sm:$0xff]  ;;  %s1689_s17 = smov 8  }
  0x11   :  { %385 = vmatpush.bf16.msra.mxu1 %v1277_v1  ;;  %v1275_v5 = vld [vmem:[#allocation5 + $0x68] sm:$0xff]  ;;  %v1266_v6 = vld [vmem:[#allocation5 + $0x20] sm:$0xff]  ;;  %v1265_v8 = vld [vmem:[#allocation5 + $0x18] sm:$0xff] }
  0x12   :  { %v1274_v7 = vld [vmem:[#allocation5 + $0x60] sm:$0xff]  ;;  %v1273_v9 = vld [vmem:[#allocation5 + $0x58] sm:$0xff]  ;;  %v1264_v10 = vld [vmem:[#allocation5 + $0x10] sm:$0xff] }
  0x13   :  { %v1272_v11 = vld [vmem:[#allocation5 + $0x50] sm:$0xff]  ;;  %v1263_v12 = vld [vmem:[#allocation5 + $0x8] sm:$0xff]  ;;  %v1262_v14 = vld [vmem:[#allocation5] sm:$0xff] }
  0x14   :  { %297 = vmatpush.bf16.msra.mxu0 %v1268_v2  ;;  %1287 = vmatpush.bf16.msra.mxu3 %v1268_v2  ;;  %v1271_v13 = vld [vmem:[#allocation5 + $0x48] sm:$0xff]  ;;  %v68_v15 = vld [vmem:[#allocation2] sm:$0xff]  ;;  %v70_v16 = vld [vmem:[#allocation2 + $0x10] sm:$0xff] }
  0x15   :  { %386 = vmatpush.bf16.msra.mxu1 %v1276_v3  ;;  %v116_v17 = vld [vmem:[#allocation2 + $0x180] sm:$0xff]  ;;  %v118_v18 = vld [vmem:[#allocation2 + $0x190] sm:$0xff]  ;;  %v69_v20 = vld [vmem:[#allocation2 + $0x8] sm:$0xff]  ;;  %v132_v22 = vpack.c.bf16 %v70_v16, %v68_v15 }
  0x16   :  { %v1270_v19 = vld [vmem:[#allocation5 + $0x40] sm:$0xff]  ;;  %v71_v21 = vld [vmem:[#allocation2 + $0x18] sm:$0xff]  ;;  %v156_v23 = vpack.c.bf16 %v118_v18, %v116_v17  ;;  %v74_v26 = vld [vmem:[#allocation2 + $0x30] sm:$0xff] }
  0x17   :  { %v133_v24 = vpack.c.bf16 %v71_v21, %v69_v20  ;;  %v72_v25 = vld [vmem:[#allocation2 + $0x20] sm:$0xff]  ;;  %v122_v28 = vld [vmem:[#allocation2 + $0x1b0] sm:$0xff]  ;;  %v73_v29 = vld [vmem:[#allocation2 + $0x28] sm:$0xff] }
  0x18   :  { %298 = vmatpush.bf16.msra.mxu0 %v1267_v4  ;;  %1288 = vmatpush.bf16.msra.mxu3 %v1267_v4  ;;  %v120_v27 = vld [vmem:[#allocation2 + $0x1a0] sm:$0xff]  ;;  %v75_v30 = vld [vmem:[#allocation2 + $0x38] sm:$0xff]  ;;  %v134_v31 = vpack.c.bf16 %v74_v26, %v72_v25  ;;  %v78_v35 = vld [vmem:[#allocation2 + $0x50] sm:$0xff] }
  0x19   :  { %387 = vmatpush.bf16.msra.mxu1 %v1275_v5  ;;  %v158_v32 = vpack.c.bf16 %v122_v28, %v120_v27  ;;  %v135_v33 = vpack.c.bf16 %v75_v30, %v73_v29  ;;  %v76_v34 = vld [vmem:[#allocation2 + $0x40] sm:$0xff]  ;;  %v126_v37 = vld [vmem:[#allocation2 + $0x1d0] sm:$0xff]  ;;  %v77_v38 = vld [vmem:[#allocation2 + $0x48] sm:$0xff] }
  0x1a   :  { %v124_v36 = vld [vmem:[#allocation2 + $0x1c0] sm:$0xff]  ;;  %v79_v39 = vld [vmem:[#allocation2 + $0x58] sm:$0xff]  ;;  %v136_v40 = vpack.c.bf16 %v78_v35, %v76_v34  ;;  %v82_v44 = vld [vmem:[#allocation2 + $0x70] sm:$0xff] }
  0x1b   :  { %v160_v41 = vpack.c.bf16 %v126_v37, %v124_v36  ;;  %v137_v42 = vpack.c.bf16 %v79_v39, %v77_v38  ;;  %v80_v43 = vld [vmem:[#allocation2 + $0x60] sm:$0xff]  ;;  %v130_v46 = vld [vmem:[#allocation2 + $0x1f0] sm:$0xff]  ;;  %v81_v47 = vld [vmem:[#allocation2 + $0x68] sm:$0xff] }
  0x1c   :  { %299 = vmatpush.bf16.msra.mxu0 %v1266_v6  ;;  %1289 = vmatpush.bf16.msra.mxu3 %v1266_v6  ;;  %v128_v45 = vld [vmem:[#allocation2 + $0x1e0] sm:$0xff]  ;;  %v83_v48 = vld [vmem:[#allocation2 + $0x78] sm:$0xff]  ;;  %v138_v49 = vpack.c.bf16 %v82_v44, %v80_v43  ;;  %v86_v53 = vld [vmem:[#allocation2 + $0x90] sm:$0xff] }
  0x1d   :  { %388 = vmatpush.bf16.msra.mxu1 %v1274_v7  ;;  %v162_v50 = vpack.c.bf16 %v130_v46, %v128_v45  ;;  %v139_v51 = vpack.c.bf16 %v83_v48, %v81_v47  ;;  %v84_v52 = vld [vmem:[#allocation2 + $0x80] sm:$0xff]  ;;  %v117_v54 = vld [vmem:[#allocation2 + $0x188] sm:$0xff]  ;;  %v119_v55 = vld [vmem:[#allocation2 + $0x198] sm:$0xff] }
  0x1e   :  { %v85_v56 = vld [vmem:[#allocation2 + $0x88] sm:$0xff]  ;;  %v87_v57 = vld [vmem:[#allocation2 + $0x98] sm:$0xff]  ;;  %v140_v58 = vpack.c.bf16 %v86_v53, %v84_v52  ;;  %v157_v59 = vpack.c.bf16 %v119_v55, %v117_v54  ;;  %v88_v61 = vld [vmem:[#allocation2 + $0xa0] sm:$0xff] }
  0x1f   :  { %v141_v60 = vpack.c.bf16 %v87_v57, %v85_v56  ;;  %v90_v62 = vld [vmem:[#allocation2 + $0xb0] sm:$0xff]  ;;  %v121_v63 = vld [vmem:[#allocation2 + $0x1a8] sm:$0xff]  ;;  %v123_v0 = vld [vmem:[#allocation2 + $0x1b8] sm:$0xff] }
  0x20   :  { %300 = vmatpush.bf16.msra.mxu0 %v1265_v8  ;;  %1290 = vmatpush.bf16.msra.mxu3 %v1265_v8  ;;  %v91_v2 = vld [vmem:[#allocation2 + $0xb8] sm:$0xff]  ;;  %v159_v4 = vpack.c.bf16 %v123_v0, %v121_v63  ;;  %v92_v8 = vld [vmem:[#allocation2 + $0xc0] sm:$0xff]  ;;  %v1283_v17 = vld [vmem:[#allocation7 + $0x28] sm:$0xff] }
  0x21   :  { %389 = vmatpush.bf16.msra.mxu1 %v1273_v9  ;;  %v1285_v6 = vld [vmem:[#allocation7 + $0x38] sm:$0xff]  ;;  %v1282_v18 = vld [vmem:[#allocation7 + $0x20] sm:$0xff]  ;;  %v98_v21 = vld [vmem:[#allocation2 + $0xf0] sm:$0xff] }
  0x22   :  { %638 = vmatpush.bf16.msra.mxu2 %v1285_v6  ;;  %v96_v20 = vld [vmem:[#allocation2 + $0xe0] sm:$0xff]  ;;  %v99_v25 = vld [vmem:[#allocation2 + $0xf8] sm:$0xff]  ;;  %v1280_v26 = vld [vmem:[#allocation7 + $0x10] sm:$0xff] }
  0x23   :  { %v146_v27 = vpack.c.bf16 %v98_v21, %v96_v20  ;;  %v1279_v30 = vld [vmem:[#allocation7 + $0x8] sm:$0xff]  ;;  %v103_v35 = vld [vmem:[#allocation2 + $0x118] sm:$0xff]  ;;  %v104_v48 = vld [vmem:[#allocation2 + $0x120] sm:$0xff] }
  0x24   :  { %301 = vmatpush.bf16.msra.mxu0 %v1264_v10  ;;  %1291 = vmatpush.bf16.msra.mxu3 %v1264_v10  ;;  %v125_v10 = vld [vmem:[#allocation2 + $0x1c8] sm:$0xff]  ;;  %v107_v52 = vld [vmem:[#allocation2 + $0x138] sm:$0xff] }
  0x25   :  { %390 = vmatpush.bf16.msra.mxu1 %v1272_v11  ;;  %v101_v34 = vld [vmem:[#allocation2 + $0x108] sm:$0xff] }
  0x26   :  { %v149_v38 = vpack.c.bf16 %v103_v35, %v101_v34 }
  0x28   :  { %302 = vmatpush.bf16.msra.mxu0 %v1263_v12  ;;  %1292 = vmatpush.bf16.msra.mxu3 %v1263_v12  ;;  %v93_v12 = vld [vmem:[#allocation2 + $0xc8] sm:$0xff] }
  0x29   :  { %391 = vmatpush.bf16.msra.mxu1 %v1271_v13 }
  0x2c   :  { %303 = vmatpush.bf16.msra.mxu0 %v1262_v14  ;;  %1293 = vmatpush.bf16.msra.mxu3 %v1262_v14 }
  0x2d   :  { %392 = vmatpush.bf16.msra.mxu1 %v1270_v19 }
  0x2f   :  { %304 = vmatmul.bf16.vlgmr.msra.gmra.mxu0 %v132_v22  ;;  %364 = vmatmul.bf16.vlgmr.msra.gmra.mxu3 %v156_v23  ;;  %v129_v22 = vld [vmem:[#allocation2 + $0x1e8] sm:$0xff]  ;;  %v131_v23 = vld [vmem:[#allocation2 + $0x1f8] sm:$0xff] }
  0x30   :  { %1294 = vmatpush.bf16.msrb.mxu3 %v1277_v1  ;;  %393 = vmatmul.bf16.vlgmr.msra.gmra.mxu1 %v133_v24  ;;  %v89_v1 = vld [vmem:[#allocation2 + $0xa8] sm:$0xff]  ;;  %v163_v28 = vpack.c.bf16 %v131_v23, %v129_v22 }
  0x31   :  { %v97_v24 = vld [vmem:[#allocation2 + $0xe8] sm:$0xff] }
  0x32   :  { %v147_v29 = vpack.c.bf16 %v99_v25, %v97_v24 }
  0x34   :  { %1295 = vmatpush.bf16.msrb.mxu3 %v1276_v3  ;;  %v142_v3 = vpack.c.bf16 %v90_v62, %v88_v61 }
  0x38   :  { %1296 = vmatpush.bf16.msrb.mxu3 %v1275_v5  ;;  %v143_v5 = vpack.c.bf16 %v91_v2, %v89_v1 }
  0x3c   :  { %1297 = vmatpush.bf16.msrb.mxu3 %v1274_v7  ;;  %v1284_v7 = vld [vmem:[#allocation7 + $0x30] sm:$0xff] }
  0x3d   :  { %639 = vmatpush.bf16.msra.mxu2 %v1284_v7 }
  0x3f   :  { %309 = vmatmul.bf16.gmra.mxu0 %v134_v31  ;;  %369 = vmatmul.bf16.gmra.mxu3 %v158_v32  ;;  %v1278_v31 = vld [vmem:[#allocation7] sm:$0xff] }
  0x40   :  { %1298 = vmatpush.bf16.msrb.mxu3 %v1273_v9  ;;  %398 = vmatmul.bf16.gmra.mxu1 %v135_v33  ;;  %v94_v9 = vld [vmem:[#allocation2 + $0xd0] sm:$0xff]  ;;  %v100_v32 = vld [vmem:[#allocation2 + $0x100] sm:$0xff] }
  0x41   :  { %v144_v14 = vpack.c.bf16 %v94_v9, %v92_v8  ;;  %640 = vmatpush.bf16.msra.mxu2 %v1283_v17  ;;  %v102_v33 = vld [vmem:[#allocation2 + $0x110] sm:$0xff]  ;;  %v109_v9 = vld [vmem:[#allocation2 + $0x148] sm:$0xff] }
  0x42   :  { %v148_v36 = vpack.c.bf16 %v102_v33, %v100_v32  ;;  %v115_v32 = vld [vmem:[#allocation2 + $0x178] sm:$0xff] }
  0x44   :  { %1299 = vmatpush.bf16.msrb.mxu3 %v1272_v11  ;;  %v127_v11 = vld [vmem:[#allocation2 + $0x1d8] sm:$0xff] }
  0x45   :  { %v161_v15 = vpack.c.bf16 %v127_v11, %v125_v10  ;;  %641 = vmatpush.bf16.msra.mxu2 %v1282_v18  ;;  %v111_v10 = vld [vmem:[#allocation2 + $0x158] sm:$0xff] }
  0x48   :  { %1300 = vmatpush.bf16.msrb.mxu3 %v1271_v13  ;;  %v95_v13 = vld [vmem:[#allocation2 + $0xd8] sm:$0xff] }
  0x49   :  { %v145_v16 = vpack.c.bf16 %v95_v13, %v93_v12 }
  0x4c   :  { %1301 = vmatpush.bf16.msrb.mxu3 %v1270_v19  ;;  %v1281_v19 = vld [vmem:[#allocation7 + $0x18] sm:$0xff] }
  0x4d   :  { %642 = vmatpush.bf16.msra.mxu2 %v1281_v19 }
  0x4f   :  { %314 = vmatmul.bf16.gmra.mxu0 %v136_v40  ;;  %374 = vmatmul.bf16.gmra.mxu3 %v160_v41  ;;  %v1732_v40 = vld [vmem:[%s2164_s2] ss:$0 sm:$0xff] }
  0x50   :  { %403 = vmatmul.bf16.gmra.mxu1 %v137_v42  ;;  %1302 = vmatpush.bf16.msra.mxu3 %v1285_v6  ;;  %v108_v6 = vld [vmem:[#allocation2 + $0x140] sm:$0xff] }
  0x51   :  { %643 = vmatpush.bf16.msra.mxu2 %v1280_v26 }
  0x54   :  { %1303 = vmatpush.bf16.msra.mxu3 %v1284_v7  ;;  %v110_v7 = vld [vmem:[#allocation2 + $0x150] sm:$0xff] }
  0x55   :  { %644 = vmatpush.bf16.msra.mxu2 %v1279_v30 }
  0x58   :  { %1304 = vmatpush.bf16.msra.mxu3 %v1283_v17 }
  0x59   :  { %645 = vmatpush.bf16.msra.mxu2 %v1278_v31 }
  0x5c   :  { %1305 = vmatpush.bf16.msra.mxu3 %v1282_v18 }
  0x5f   :  { %319 = vmatmul.bf16.gmra.mxu0 %v138_v49  ;;  %379 = vmatmul.bf16.gmra.mxu3 %v162_v50  ;;  %v106_v49 = vld [vmem:[#allocation2 + $0x130] sm:$0xff] }
  0x60   :  { %408 = vmatmul.bf16.gmra.mxu1 %v139_v51  ;;  %1306 = vmatpush.bf16.msra.mxu3 %v1281_v19  ;;  %v105_v51 = vld [vmem:[#allocation2 + $0x128] sm:$0xff]  ;;  %v150_v56 = vpack.c.bf16 %v106_v49, %v104_v48 }
  0x64   :  { %1307 = vmatpush.bf16.msra.mxu3 %v1280_v26 }
  0x68   :  { %1308 = vmatpush.bf16.msra.mxu3 %v1279_v30 }
  0x6c   :  { %1309 = vmatpush.bf16.msra.mxu3 %v1278_v31  ;;  %v113_v31 = vld [vmem:[#allocation2 + $0x168] sm:$0xff] }
  0x6f   :  { %324 = vmatmul.bf16.gmra.mxu0 %v140_v58  ;;  %453 = vmatmul.bf16.vlgmr.msrb.gmra.mxu3 %v157_v59  ;;  %v151_v58 = vpack.c.bf16 %v107_v52, %v105_v51 }
  0x70   :  { %413 = vmatmul.bf16.gmra.mxu1 %v141_v60 }
  0x7f   :  { %329 = vmatmul.bf16.gmra.mxu0 %v142_v3  ;;  %458 = vmatmul.bf16.gmra.mxu3 %v159_v4 }
  0x80   :  { %418 = vmatmul.bf16.gmra.mxu1 %v143_v5 }
  0x8f   :  { %334 = vmatmul.bf16.gmra.mxu0 %v144_v14  ;;  %463 = vmatmul.bf16.gmra.mxu3 %v161_v15  ;;  %v152_v14 = vpack.c.bf16 %v110_v7, %v108_v6 }
  0x90   :  { %423 = vmatmul.bf16.gmra.mxu1 %v145_v16  ;;  %v153_v16 = vpack.c.bf16 %v111_v10, %v109_v9 }
  0x9f   :  { %339 = vmatmul.bf16.gmra.mxu0 %v146_v27  ;;  %468 = vmatmul.bf16.gmra.mxu3 %v163_v28  ;;  %v112_v28 = vld [vmem:[#allocation2 + $0x160] sm:$0xff] }
  0xa0   :  { %428 = vmatmul.bf16.gmra.mxu1 %v147_v29  ;;  %v114_v29 = vld [vmem:[#allocation2 + $0x170] sm:$0xff] }
  0xac   :  { %v305_v37 = vpop.f32.mrf.mxu0 }
  0xad   :  { %v394_v39 = vpop.f32.mrf.mxu1  ;;  %v306_v42 = vadd.f32 %v1732_v40, %v305_v37 }
  0xaf   :  { %344 = vmatmul.bf16.gmra.mxu0 %v148_v36  ;;  %v395_v46 = vadd.f32 %v394_v39, %v306_v42  ;;  %v154_v36 = vpack.c.bf16 %v114_v29, %v112_v28 }
  0xb0   :  { %433 = vmatmul.bf16.gmra.mxu1 %v149_v38  ;;  %v155_v38 = vpack.c.bf16 %v115_v32, %v113_v31 }
  0xb2   :  { %v1734_v41 = vpop.f32.mrf.mxu3 }
  0xb3   :  { %v366_v6 = vadd.f32 %v1732_v40, %v1734_v41 }
  0xb4   :  { %v307_v43 = vpop.f32.mrf.mxu0 }
  0xb5   :  { %v308_v44 = vadd.f32 %v1732_v40, %v307_v43  ;;  %v396_v45 = vpop.f32.mrf.mxu1 }
  0xb7   :  { %v397_v47 = vadd.f32 %v396_v45, %v308_v44 }
  0xb9   :  { %v474_v50 = vpack.c.bf16 %v397_v47, %v395_v46 }
  0xba   :  { %v1738_v53 = vpop.f32.mrf.mxu3 }
  0xbb   :  { %v490_v54 = vunpack.c.l.bf16 %v474_v50  ;;  %v491_v55 = vunpack.c.h.bf16 %v474_v50  ;;  %v368_v7 = vadd.f32 %v1732_v40, %v1738_v53 }
  0xbc   :  { %v310_v57 = vpop.f32.mrf.mxu0 }
  0xbd   :  { %1322 = vtanh.f32 %v490_v54  ;;  %v399_v59 = vpop.f32.mrf.mxu1  ;;  %v311_v62 = vadd.f32 %v1732_v40, %v310_v57 }
  0xbe   :  { %1324 = vtanh.f32 %v491_v55 }
  0xbf   :  { %349 = vmatmul.bf16.gmra.mxu0 %v150_v56  ;;  %v400_v4 = vadd.f32 %v399_v59, %v311_v62 }
  0xc0   :  { %438 = vmatmul.bf16.gmra.mxu1 %v151_v58 }
  0xc2   :  { %v1740_v60 = vpop.f32.mrf.mxu3 }
  0xc3   :  { %v1323_v61 = vpop.eup %1322  ;;  %v371_v31 = vadd.f32 %v1732_v40, %v1740_v60 }
  0xc4   :  { %v1325_v63 = vpop.eup %1324  ;;  %v312_v0 = vpop.f32.mrf.mxu0 }
  0xc5   :  { %v313_v1 = vadd.f32 %v1732_v40, %v312_v0  ;;  %v401_v2 = vpop.f32.mrf.mxu1  ;;  %v554_v3 = vpack.c.bf16 %v1325_v63, %v1323_v61 }
  0xc7   :  { %v402_v5 = vadd.f32 %v401_v2, %v313_v1  ;;  %646 = vmatmul.bf16.vlgmr.msra.gmra.mxu2 %v554_v3 }
  0xc9   :  { %v475_v8 = vpack.c.bf16 %v402_v5, %v400_v4 }
  0xca   :  { %v1744_v11 = vpop.f32.mrf.mxu3 }
  0xcb   :  { %v492_v12 = vunpack.c.l.bf16 %v475_v8  ;;  %v493_v13 = vunpack.c.h.bf16 %v475_v8  ;;  %v373_v32 = vadd.f32 %v1732_v40, %v1744_v11 }
  0xcc   :  { %v315_v15 = vpop.f32.mrf.mxu0 }
  0xcd   :  { %1326 = vtanh.f32 %v492_v12  ;;  %v404_v17 = vpop.f32.mrf.mxu1  ;;  %v316_v20 = vadd.f32 %v1732_v40, %v315_v15 }
  0xce   :  { %1328 = vtanh.f32 %v493_v13 }
  0xcf   :  { %354 = vmatmul.bf16.gmra.mxu0 %v152_v14  ;;  %v405_v26 = vadd.f32 %v404_v17, %v316_v20 }
  0xd0   :  { %443 = vmatmul.bf16.gmra.mxu1 %v153_v16 }
  0xd2   :  { %v1746_v18 = vpop.f32.mrf.mxu3 }
  0xd3   :  { %v1327_v19 = vpop.eup %1326 }
  0xd4   :  { %v1329_v21 = vpop.eup %1328  ;;  %v317_v22 = vpop.f32.mrf.mxu0 }
  0xd5   :  { %v318_v23 = vadd.f32 %v1732_v40, %v317_v22  ;;  %v406_v24 = vpop.f32.mrf.mxu1  ;;  %v555_v25 = vpack.c.bf16 %v1329_v21, %v1327_v19 }
  0xd7   :  { %v407_v27 = vadd.f32 %v406_v24, %v318_v23  ;;  %651 = vmatmul.bf16.gmra.mxu2 %v555_v25 }
  0xd9   :  { %v476_v30 = vpack.c.bf16 %v407_v27, %v405_v26 }
  0xda   :  { %v1750_v33 = vpop.f32.mrf.mxu3 }
  0xdb   :  { %v494_v34 = vunpack.c.l.bf16 %v476_v30  ;;  %v495_v35 = vunpack.c.h.bf16 %v476_v30 }
  0xdc   :  { %v320_v37 = vpop.f32.mrf.mxu0 }
  0xdd   :  { %1330 = vtanh.f32 %v494_v34  ;;  %v409_v39 = vpop.f32.mrf.mxu1  ;;  %v321_v44 = vadd.f32 %v1732_v40, %v320_v37 }
  0xde   :  { %1332 = vtanh.f32 %v495_v35 }
  0xdf   :  { %359 = vmatmul.bf16.gmra.mxu0 %v154_v36  ;;  %v410_v50 = vadd.f32 %v409_v39, %v321_v44 }
  0xe0   :  { %448 = vmatmul.bf16.gmra.mxu1 %v155_v38 }
  0xe2   :  { %v1752_v42 = vpop.f32.mrf.mxu3 }
  0xe3   :  { %v1331_v43 = vpop.eup %1330 }
  0xe4   :  { %v1333_v45 = vpop.eup %1332  ;;  %v322_v46 = vpop.f32.mrf.mxu0 }
  0xe5   :  { %v323_v47 = vadd.f32 %v1732_v40, %v322_v46  ;;  %v411_v48 = vpop.f32.mrf.mxu1  ;;  %v556_v49 = vpack.c.bf16 %v1333_v45, %v1331_v43 }
  0xe7   :  { %v412_v51 = vadd.f32 %v411_v48, %v323_v47  ;;  %656 = vmatmul.bf16.gmra.mxu2 %v556_v49 }
  0xe9   :  { %v477_v52 = vpack.c.bf16 %v412_v51, %v410_v50 }
  0xea   :  { %v1756_v54 = vpop.f32.mrf.mxu3 }
  0xeb   :  { %v496_v55 = vunpack.c.l.bf16 %v477_v52  ;;  %v497_v56 = vunpack.c.h.bf16 %v477_v52 }
  0xec   :  { %v325_v57 = vpop.f32.mrf.mxu0 }
  0xed   :  { %1334 = vtanh.f32 %v496_v55  ;;  %v414_v58 = vpop.f32.mrf.mxu1  ;;  %v326_v62 = vadd.f32 %v1732_v40, %v325_v57 }
  0xee   :  { %1336 = vtanh.f32 %v497_v56 }
  0xef   :  { %v415_v4 = vadd.f32 %v414_v58, %v326_v62  ;;  %v376_v62 = vadd.f32 %v1732_v40, %v1746_v18 }
  0xf2   :  { %v454_v59 = vpop.f32.mrf.mxu3 }
  0xf3   :  { %v1335_v61 = vpop.eup %1334  ;;  %v455_v10 = vadd.f32 %v454_v59, %v366_v6 }
  0xf4   :  { %v1337_v63 = vpop.eup %1336  ;;  %v327_v0 = vpop.f32.mrf.mxu0 }
  0xf5   :  { %v328_v1 = vadd.f32 %v1732_v40, %v327_v0  ;;  %v416_v2 = vpop.f32.mrf.mxu1  ;;  %v557_v3 = vpack.c.bf16 %v1337_v63, %v1335_v61  ;;  %v378_v63 = vadd.f32 %v1732_v40, %v1750_v33 }
  0xf7   :  { %v417_v5 = vadd.f32 %v416_v2, %v328_v1  ;;  %661 = vmatmul.bf16.gmra.mxu2 %v557_v3 }
  0xf9   :  { %v478_v8 = vpack.c.bf16 %v417_v5, %v415_v4 }
  0xfa   :  { %v456_v9 = vpop.f32.mrf.mxu3 }
  0xfb   :  { %v498_v12 = vunpack.c.l.bf16 %v478_v8  ;;  %v499_v13 = vunpack.c.h.bf16 %v478_v8  ;;  %v457_v14 = vadd.f32 %v456_v9, %v368_v7 }
  0xfc   :  { %v330_v15 = vpop.f32.mrf.mxu0 }
  0xfd   :  { %1338 = vtanh.f32 %v498_v12  ;;  %v486_v16 = vpack.c.bf16 %v457_v14, %v455_v10  ;;  %v419_v17 = vpop.f32.mrf.mxu1  ;;  %v331_v22 = vadd.f32 %v1732_v40, %v330_v15 }
  0xfe   :  { %1340 = vtanh.f32 %v499_v13 }
  0xff   :  { %v514_v19 = vunpack.c.l.bf16 %v486_v16  ;;  %v515_v20 = vunpack.c.h.bf16 %v486_v16  ;;  %v420_v28 = vadd.f32 %v419_v17, %v331_v22 }
 0x101   :  { %1342 = vtanh.f32 %v514_v19 }
 0x102   :  { %1344 = vtanh.f32 %v515_v20  ;;  %v459_v21 = vpop.f32.mrf.mxu3 }
 0x103   :  { %v1339_v41 = vpop.eup %1338  ;;  %v460_v37 = vadd.f32 %v459_v21, %v371_v31 }
 0x104   :  { %v1341_v53 = vpop.eup %1340  ;;  %v332_v23 = vpop.f32.mrf.mxu0 }
 0x105   :  { %v333_v24 = vadd.f32 %v1732_v40, %v332_v23  ;;  %v421_v25 = vpop.f32.mrf.mxu1  ;;  %v558_v26 = vpack.c.bf16 %v1341_v53, %v1339_v41  ;;  %v381_v53 = vadd.f32 %v1732_v40, %v1752_v42  ;;  %v383_v23 = vadd.f32 %v1732_v40, %v1756_v54 }
 0x107   :  { %v1343_v27 = vpop.eup %1342  ;;  %v422_v29 = vadd.f32 %v421_v25, %v333_v24  ;;  %666 = vmatmul.bf16.gmra.mxu2 %v558_v26 }
 0x108   :  { %v1345_v30 = vpop.eup %1344 }
 0x109   :  { %v479_v34 = vpack.c.bf16 %v422_v29, %v420_v28  ;;  %v566_v35 = vpack.c.bf16 %v1345_v30, %v1343_v27 }
 0x10a   :  { %v461_v36 = vpop.f32.mrf.mxu3 }
 0x10b   :  { %v500_v38 = vunpack.c.l.bf16 %v479_v34  ;;  %v501_v39 = vunpack.c.h.bf16 %v479_v34  ;;  %v462_v43 = vadd.f32 %v461_v36, %v373_v32  ;;  %706 = vmatmul.bf16.vlgmr.msra.gmra.mxu3 %v566_v35 }
 0x10c   :  { %v335_v44 = vpop.f32.mrf.mxu0 }
 0x10d   :  { %1346 = vtanh.f32 %v500_v38  ;;  %v487_v45 = vpack.c.bf16 %v462_v43, %v460_v37  ;;  %v424_v46 = vpop.f32.mrf.mxu1  ;;  %v336_v11 = vadd.f32 %v1732_v40, %v335_v44 }
 0x10e   :  { %1348 = vtanh.f32 %v501_v39 }
 0x10f   :  { %v516_v47 = vunpack.c.l.bf16 %v487_v45  ;;  %v517_v48 = vunpack.c.h.bf16 %v487_v45  ;;  %v425_v58 = vadd.f32 %v424_v46, %v336_v11 }
 0x111   :  { %1350 = vtanh.f32 %v516_v47 }
 0x112   :  { %1352 = vtanh.f32 %v517_v48  ;;  %v464_v60 = vpop.f32.mrf.mxu3 }
 0x113   :  { %v1347_v49 = vpop.eup %1346  ;;  %v465_v3 = vadd.f32 %v464_v60, %v376_v62 }
 0x114   :  { %v1349_v50 = vpop.eup %1348  ;;  %v337_v51 = vpop.f32.mrf.mxu0 }
 0x115   :  { %v338_v52 = vadd.f32 %v1732_v40, %v337_v51  ;;  %v426_v55 = vpop.f32.mrf.mxu1  ;;  %v559_v56 = vpack.c.bf16 %v1349_v50, %v1347_v49 }
 0x117   :  { %v1351_v57 = vpop.eup %1350  ;;  %v427_v59 = vadd.f32 %v426_v55, %v338_v52  ;;  %671 = vmatmul.bf16.gmra.mxu2 %v559_v56 }
 0x118   :  { %v1353_v61 = vpop.eup %1352 }
 0x119   :  { %v480_v0 = vpack.c.bf16 %v427_v59, %v425_v58  ;;  %v567_v1 = vpack.c.bf16 %v1353_v61, %v1351_v57 }
 0x11a   :  { %v466_v2 = vpop.f32.mrf.mxu3 }
 0x11b   :  { %v502_v4 = vunpack.c.l.bf16 %v480_v0  ;;  %v503_v5 = vunpack.c.h.bf16 %v480_v0  ;;  %v467_v6 = vadd.f32 %v466_v2, %v378_v63  ;;  %711 = vmatmul.bf16.gmra.mxu3 %v567_v1  ;;  %v1789_v1 = vld [vmem:[%s2166_s4] ss:$0 sm:$0xff]  ;;  %s1687_s4 = smov [#allocation8]  }
 0x11c   :  { %v340_v7 = vpop.f32.mrf.mxu0  ;;  %s1150_s12 = sshll.u32 %s1687_s4, 4  ;;  %s1151_s12 = int_to_ptr.vmem [resolvable:$true] %s1150_s12 }
 0x11d   :  { %1354 = vtanh.f32 %v502_v4  ;;  %v488_v8 = vpack.c.bf16 %v467_v6, %v465_v3  ;;  %v429_v9 = vpop.f32.mrf.mxu1  ;;  %v341_v33 = vadd.f32 %v1732_v40, %v340_v7  ;;  %v759_v7 = vlaneseq }
 0x11e   :  { %1356 = vtanh.f32 %v503_v5 }
 0x11f   :  { %v518_v10 = vunpack.c.l.bf16 %v488_v8  ;;  %v519_v12 = vunpack.c.h.bf16 %v488_v8  ;;  %v430_v21 = vadd.f32 %v429_v9, %v341_v33 }
 0x121   :  { %1358 = vtanh.f32 %v518_v10  ;;  %v1792_v10 = vand.u32 127, %v759_v7 }
 0x122   :  { %1360 = vtanh.f32 %v519_v12  ;;  %v469_v18 = vpop.f32.mrf.mxu3 }
 0x123   :  { %v1355_v13 = vpop.eup %1354  ;;  %v470_v27 = vadd.f32 %v469_v18, %v381_v53  ;;  %vm761_vm0 = vcmp.lt.s32.totalorder %v1792_v10, 10 }
 0x124   :  { %v1357_v14 = vpop.eup %1356  ;;  %v342_v15 = vpop.f32.mrf.mxu0 }
 0x125   :  { %v343_v16 = vadd.f32 %v1732_v40, %v342_v15  ;;  %v431_v17 = vpop.f32.mrf.mxu1  ;;  %v560_v19 = vpack.c.bf16 %v1357_v14, %v1355_v13 }
 0x127   :  { %v1359_v20 = vpop.eup %1358  ;;  %v432_v41 = vadd.f32 %v431_v17, %v343_v16  ;;  %676 = vmatmul.bf16.gmra.mxu2 %v560_v19 }
 0x128   :  { %v1361_v22 = vpop.eup %1360 }
 0x129   :  { %v481_v24 = vpack.c.bf16 %v432_v41, %v430_v21  ;;  %v568_v25 = vpack.c.bf16 %v1361_v22, %v1359_v20 }
 0x12a   :  { %v471_v26 = vpop.f32.mrf.mxu3 }
 0x12b   :  { %v504_v28 = vunpack.c.l.bf16 %v481_v24  ;;  %v505_v29 = vunpack.c.h.bf16 %v481_v24  ;;  %v472_v30 = vadd.f32 %v471_v26, %v383_v23  ;;  %716 = vmatmul.bf16.gmra.mxu3 %v568_v25 }
 0x12c   :  { %v345_v31 = vpop.f32.mrf.mxu0 }
 0x12d   :  { %1362 = vtanh.f32 %v504_v28  ;;  %v489_v32 = vpack.c.bf16 %v472_v30, %v470_v27  ;;  %v434_v34 = vpop.f32.mrf.mxu1  ;;  %v346_v54 = vadd.f32 %v1732_v40, %v345_v31 }
 0x12e   :  { %1364 = vtanh.f32 %v505_v29 }
 0x12f   :  { %v520_v35 = vunpack.c.l.bf16 %v489_v32  ;;  %v521_v36 = vunpack.c.h.bf16 %v489_v32  ;;  %v435_v46 = vadd.f32 %v434_v34, %v346_v54 }
 0x131   :  { %1366 = vtanh.f32 %v520_v35 }
 0x132   :  { %1368 = vtanh.f32 %v521_v36 }
 0x133   :  { %v1363_v42 = vpop.eup %1362 }
 0x134   :  { %v1365_v37 = vpop.eup %1364  ;;  %v347_v38 = vpop.f32.mrf.mxu0 }
 0x135   :  { %v348_v39 = vadd.f32 %v1732_v40, %v347_v38  ;;  %v436_v43 = vpop.f32.mrf.mxu1  ;;  %v561_v44 = vpack.c.bf16 %v1365_v37, %v1363_v42 }
 0x137   :  { %v1367_v45 = vpop.eup %1366  ;;  %v437_v47 = vadd.f32 %v436_v43, %v348_v39  ;;  %681 = vmatmul.bf16.gmra.mxu2 %v561_v44 }
 0x138   :  { %v1369_v48 = vpop.eup %1368 }
 0x139   :  { %v482_v60 = vpack.c.bf16 %v437_v47, %v435_v46  ;;  %v569_v49 = vpack.c.bf16 %v1369_v48, %v1367_v45 }
 0x13b   :  { %v506_v11 = vunpack.c.l.bf16 %v482_v60  ;;  %v507_v50 = vunpack.c.h.bf16 %v482_v60  ;;  %721 = vmatmul.bf16.gmra.mxu3 %v569_v49 }
 0x13c   :  { %v350_v51 = vpop.f32.mrf.mxu0 }
 0x13d   :  { %1370 = vtanh.f32 %v506_v11  ;;  %v439_v52 = vpop.f32.mrf.mxu1  ;;  %v351_v56 = vadd.f32 %v1732_v40, %v350_v51 }
 0x13e   :  { %1372 = vtanh.f32 %v507_v50 }
 0x13f   :  { %v440_v63 = vadd.f32 %v439_v52, %v351_v56 }
 0x143   :  { %v1371_v55 = vpop.eup %1370 }
 0x144   :  { %v1373_v57 = vpop.eup %1372  ;;  %v352_v58 = vpop.f32.mrf.mxu0 }
 0x145   :  { %v353_v59 = vadd.f32 %v1732_v40, %v352_v58  ;;  %v441_v61 = vpop.f32.mrf.mxu1  ;;  %v562_v62 = vpack.c.bf16 %v1373_v57, %v1371_v55 }
 0x147   :  { %v442_v0 = vadd.f32 %v441_v61, %v353_v59  ;;  %686 = vmatmul.bf16.gmra.mxu2 %v562_v62 }
 0x149   :  { %v483_v2 = vpack.c.bf16 %v442_v0, %v440_v63 }
 0x14a   :  { %v647_v3 = vpop.f32.mrf.mxu2 }
 0x14b   :  { %v508_v4 = vunpack.c.l.bf16 %v483_v2  ;;  %v509_v5 = vunpack.c.h.bf16 %v483_v2  ;;  %v648_v6 = vadd.f32 %v1789_v1, %v647_v3 }
 0x14c   :  { %v355_v8 = vpop.f32.mrf.mxu0 }
 0x14d   :  { %1374 = vtanh.f32 %v508_v4  ;;  %v444_v9 = vpop.f32.mrf.mxu1  ;;  %v356_v13 = vadd.f32 %v1732_v40, %v355_v8 }
 0x14e   :  { %1376 = vtanh.f32 %v509_v5 }
 0x14f   :  { %1378 = vtanh.f32 %v648_v6  ;;  %v445_v41 = vadd.f32 %v444_v9, %v356_v13 }
 0x152   :  { %v649_v12 = vpop.f32.mrf.mxu2 }
 0x153   :  { %v1375_v18 = vpop.eup %1374  ;;  %v650_v33 = vadd.f32 %v1789_v1, %v649_v12 }
 0x154   :  { %v1377_v14 = vpop.eup %1376  ;;  %v357_v15 = vpop.f32.mrf.mxu0 }
 0x155   :  { %v1379_v16 = vpop.eup %1378  ;;  %1380 = vtanh.f32 %v650_v33  ;;  %v358_v17 = vadd.f32 %v1732_v40, %v357_v15  ;;  %v446_v19 = vpop.f32.mrf.mxu1  ;;  %v563_v20 = vpack.c.bf16 %v1377_v14, %v1375_v18 }
 0x156   :  { %v1800_v21 = vsel %vm761_vm0, %v1379_v16, -1e+30 }
 0x157   :  { %v447_v22 = vadd.f32 %v446_v19, %v358_v17  ;;  %794 = vmax.xlane.f32.xlu0 %v1800_v21  ;;  %691 = vmatmul.bf16.gmra.mxu2 %v563_v20 }
 0x159   :  { %v484_v53 = vpack.c.bf16 %v447_v22, %v445_v41 }
 0x15a   :  { %v652_v23 = vpop.f32.mrf.mxu2 }
 0x15b   :  { %v1381_v24 = vpop.eup %1380  ;;  %v510_v25 = vunpack.c.l.bf16 %v484_v53  ;;  %v511_v26 = vunpack.c.h.bf16 %v484_v53  ;;  %v653_v27 = vadd.f32 %v1789_v1, %v652_v23 }
 0x15c   :  { %v360_v28 = vpop.f32.mrf.mxu0  ;;  %v1806_v29 = vsel %vm761_vm0, %v1381_v24, -1e+30 }
 0x15d   :  { %1382 = vtanh.f32 %v510_v25  ;;  %v449_v30 = vpop.f32.mrf.mxu1  ;;  %v361_v34 = vadd.f32 %v1732_v40, %v360_v28 }
 0x15e   :  { %1384 = vtanh.f32 %v511_v26 }
 0x15f   :  { %1386 = vtanh.f32 %v653_v27  ;;  %796 = vmax.xlane.f32.xlu0 %v1806_v29  ;;  %v450_v44 = vadd.f32 %v449_v30, %v361_v34 }
 0x162   :  { %v654_v31 = vpop.f32.mrf.mxu2 }
 0x163   :  { %v1383_v32 = vpop.eup %1382  ;;  %v655_v35 = vadd.f32 %v1789_v1, %v654_v31 }
 0x164   :  { %v1385_v36 = vpop.eup %1384  ;;  %v362_v42 = vpop.f32.mrf.mxu0 }
 0x165   :  { %v1387_v54 = vpop.eup %1386  ;;  %1388 = vtanh.f32 %v655_v35  ;;  %v363_v37 = vadd.f32 %v1732_v40, %v362_v42  ;;  %v564_v38 = vpack.c.bf16 %v1385_v36, %v1383_v32  ;;  %v451_v39 = vpop.f32.mrf.mxu1 }
 0x166   :  { %v1814_v43 = vsel %vm761_vm0, %v1387_v54, -1e+30 }
 0x167   :  { %v452_v45 = vadd.f32 %v451_v39, %v363_v37  ;;  %798 = vmax.xlane.f32.xlu1 %v1814_v43  ;;  %696 = vmatmul.bf16.gmra.mxu2 %v564_v38 }
 0x169   :  { %v485_v46 = vpack.c.bf16 %v452_v45, %v450_v44 }
 0x16a   :  { %v657_v47 = vpop.f32.mrf.mxu2 }
 0x16b   :  { %v1389_v48 = vpop.eup %1388  ;;  %v512_v60 = vunpack.c.l.bf16 %v485_v46  ;;  %v513_v49 = vunpack.c.h.bf16 %v485_v46  ;;  %v658_v11 = vadd.f32 %v1789_v1, %v657_v47 }
 0x16c   :  { %v1820_v40 = vsel %vm761_vm0, %v1389_v48, -1e+30 }
 0x16d   :  { %1390 = vtanh.f32 %v512_v60 }
 0x16e   :  { %1392 = vtanh.f32 %v513_v49 }
 0x16f   :  { %1394 = vtanh.f32 %v658_v11  ;;  %800 = vmax.xlane.f32.xlu1 %v1820_v40 }
 0x172   :  { %v659_v50 = vpop.f32.mrf.mxu2 }
 0x173   :  { %v1391_v51 = vpop.eup %1390  ;;  %v660_v52 = vadd.f32 %v1789_v1, %v659_v50 }
 0x174   :  { %v1393_v55 = vpop.eup %1392 }
 0x175   :  { %v1395_v56 = vpop.eup %1394  ;;  %1396 = vtanh.f32 %v660_v52  ;;  %v565_v57 = vpack.c.bf16 %v1393_v55, %v1391_v51 }
 0x176   :  { %v1826_v58 = vsel %vm761_vm0, %v1395_v56, -1e+30 }
 0x177   :  { %802 = vmax.xlane.f32.xlu2 %v1826_v58  ;;  %701 = vmatmul.bf16.gmra.mxu2 %v565_v57 }
 0x17a   :  { %v662_v59 = vpop.f32.mrf.mxu2 }
 0x17b   :  { %v1397_v61 = vpop.eup %1396  ;;  %v663_v62 = vadd.f32 %v1789_v1, %v662_v59 }
 0x17c   :  { %v1832_v63 = vsel %vm761_vm0, %v1397_v61, -1e+30 }
 0x17d   :  { %1398 = vtanh.f32 %v663_v62 }
 0x17f   :  { %804 = vmax.xlane.f32.xlu2 %v1832_v63 }
 0x182   :  { %v664_v0 = vpop.f32.mrf.mxu2 }
 0x183   :  { %v1399_v2 = vpop.eup %1398  ;;  %v665_v3 = vadd.f32 %v1789_v1, %v664_v0 }
 0x184   :  { %v1838_v4 = vsel %vm761_vm0, %v1399_v2, -1e+30 }
 0x185   :  { %1400 = vtanh.f32 %v665_v3  ;;  %806 = vmax.xlane.f32.xlu0 %v1838_v4 }
 0x18a   :  { %v667_v5 = vpop.f32.mrf.mxu2 }
 0x18b   :  { %v1401_v6 = vpop.eup %1400  ;;  %v668_v7 = vadd.f32 %v1789_v1, %v667_v5 }
 0x18c   :  { %v1844_v8 = vsel %vm761_vm0, %v1401_v6, -1e+30 }
 0x18d   :  { %1402 = vtanh.f32 %v668_v7  ;;  %808 = vmax.xlane.f32.xlu1 %v1844_v8 }
 0x18e   :  { %v707_v9 = vpop.f32.mrf.mxu3 }
 0x18f   :  { %v708_v12 = vadd.f32 %v1789_v1, %v707_v9 }
 0x191   :  { %1404 = vtanh.f32 %v708_v12 }
 0x192   :  { %v669_v18 = vpop.f32.mrf.mxu2 }
 0x193   :  { %v1403_v13 = vpop.eup %1402  ;;  %v670_v33 = vadd.f32 %v1789_v1, %v669_v18 }
 0x194   :  { %v1851_v14 = vsel %vm761_vm0, %v1403_v13, -1e+30 }
 0x195   :  { %810 = vmax.xlane.f32.xlu2 %v1851_v14  ;;  %1406 = vtanh.f32 %v670_v33 }
 0x196   :  { %v709_v15 = vpop.f32.mrf.mxu3 }
 0x197   :  { %v1405_v16 = vpop.eup %1404  ;;  %v710_v17 = vadd.f32 %v1789_v1, %v709_v15 }
 0x198   :  { %v1857_v19 = vsel %vm761_vm0, %v1405_v16, -1e+30 }
 0x199   :  { %1408 = vtanh.f32 %v710_v17  ;;  %842 = vmax.xlane.f32.xlu0 %v1857_v19 }
 0x19a   :  { %v672_v20 = vpop.f32.mrf.mxu2 }
 0x19b   :  { %v673_v41 = vadd.f32 %v1789_v1, %v672_v20  ;;  %v1407_v22 = vpop.eup %1406 }
 0x19c   :  { %v1868_v26 = vsel %vm761_vm0, %v1407_v22, -1e+30 }
 0x19d   :  { %1410 = vtanh.f32 %v673_v41 }
 0x19e   :  { %v712_v53 = vpop.f32.mrf.mxu3 }
 0x19f   :  { %v1409_v23 = vpop.eup %1408  ;;  %v713_v24 = vadd.f32 %v1789_v1, %v712_v53 }
 0x1a0   :  { %v1864_v25 = vsel %vm761_vm0, %v1409_v23, -1e+30 }
 0x1a1   :  { %1412 = vtanh.f32 %v713_v24  ;;  %844 = vmax.xlane.f32.xlu1 %v1864_v25  ;;  %812 = vmax.xlane.f32.xlu0 %v1868_v26 }
 0x1a2   :  { %v674_v27 = vpop.f32.mrf.mxu2 }
 0x1a3   :  { %v675_v28 = vadd.f32 %v1789_v1, %v674_v27  ;;  %v1411_v30 = vpop.eup %1410 }
 0x1a4   :  { %v1880_v36 = vsel %vm761_vm0, %v1411_v30, -1e+30 }
 0x1a5   :  { %1414 = vtanh.f32 %v675_v28 }
 0x1a6   :  { %v714_v31 = vpop.f32.mrf.mxu3 }
 0x1a7   :  { %v1413_v32 = vpop.eup %1412  ;;  %v715_v34 = vadd.f32 %v1789_v1, %v714_v31 }
 0x1a8   :  { %v1876_v35 = vsel %vm761_vm0, %v1413_v32, -1e+30 }
 0x1a9   :  { %1416 = vtanh.f32 %v715_v34  ;;  %846 = vmax.xlane.f32.xlu2 %v1876_v35  ;;  %814 = vmax.xlane.f32.xlu1 %v1880_v36 }
 0x1aa   :  { %v677_v42 = vpop.f32.mrf.mxu2 }
 0x1ab   :  { %v678_v54 = vadd.f32 %v1789_v1, %v677_v42  ;;  %v1415_v37 = vpop.eup %1414 }
 0x1ac   :  { %v1888_v45 = vsel %vm761_vm0, %v1415_v37, -1e+30 }
 0x1ad   :  { %1418 = vtanh.f32 %v678_v54 }
 0x1ae   :  { %v717_v38 = vpop.f32.mrf.mxu3 }
 0x1af   :  { %v1417_v39 = vpop.eup %1416  ;;  %v718_v44 = vadd.f32 %v1789_v1, %v717_v38 }
 0x1b0   :  { %v1892_v46 = vsel %vm761_vm0, %v1417_v39, -1e+30 }
 0x1b1   :  { %1420 = vtanh.f32 %v718_v44  ;;  %816 = vmax.xlane.f32.xlu2 %v1888_v45  ;;  %848 = vmax.xlane.f32.xlu0 %v1892_v46 }
 0x1b2   :  { %v679_v47 = vpop.f32.mrf.mxu2 }
 0x1b3   :  { %v680_v48 = vadd.f32 %v1789_v1, %v679_v47  ;;  %v1419_v60 = vpop.eup %1418 }
 0x1b4   :  { %v1904_v52 = vsel %vm761_vm0, %v1419_v60, -1e+30 }
 0x1b5   :  { %1422 = vtanh.f32 %v680_v48 }
 0x1b6   :  { %v719_v49 = vpop.f32.mrf.mxu3 }
 0x1b7   :  { %v1421_v11 = vpop.eup %1420  ;;  %v720_v50 = vadd.f32 %v1789_v1, %v719_v49 }
 0x1b8   :  { %v1900_v51 = vsel %vm761_vm0, %v1421_v11, -1e+30 }
 0x1b9   :  { %1424 = vtanh.f32 %v720_v50  ;;  %850 = vmax.xlane.f32.xlu1 %v1900_v51  ;;  %818 = vmax.xlane.f32.xlu0 %v1904_v52 }
 0x1ba   :  { %v682_v55 = vpop.f32.mrf.mxu2 }
 0x1bb   :  { %v683_v56 = vadd.f32 %v1789_v1, %v682_v55  ;;  %v1423_v57 = vpop.eup %1422 }
 0x1bc   :  { %v1916_v2 = vsel %vm761_vm0, %v1423_v57, -1e+30 }
 0x1bd   :  { %1426 = vtanh.f32 %v683_v56 }
 0x1be   :  { %v722_v59 = vpop.f32.mrf.mxu3 }
 0x1bf   :  { %v1425_v61 = vpop.eup %1424  ;;  %v723_v62 = vadd.f32 %v1789_v1, %v722_v59 }
 0x1c0   :  { %v1912_v0 = vsel %vm761_vm0, %v1425_v61, -1e+30 }
 0x1c1   :  { %1428 = vtanh.f32 %v723_v62  ;;  %852 = vmax.xlane.f32.xlu2 %v1912_v0  ;;  %820 = vmax.xlane.f32.xlu1 %v1916_v2 }
 0x1c2   :  { %v684_v3 = vpop.f32.mrf.mxu2 }
 0x1c3   :  { %v685_v5 = vadd.f32 %v1789_v1, %v684_v3  ;;  %v1427_v6 = vpop.eup %1426 }
 0x1c4   :  { %v1924_v18 = vsel %vm761_vm0, %v1427_v6, -1e+30 }
 0x1c5   :  { %1430 = vtanh.f32 %v685_v5 }
 0x1c6   :  { %v724_v7 = vpop.f32.mrf.mxu3 }
 0x1c7   :  { %v1429_v9 = vpop.eup %1428  ;;  %v725_v12 = vadd.f32 %v1789_v1, %v724_v7 }
 0x1c8   :  { %v1928_v13 = vsel %vm761_vm0, %v1429_v9, -1e+30 }
 0x1c9   :  { %1432 = vtanh.f32 %v725_v12  ;;  %822 = vmax.xlane.f32.xlu2 %v1924_v18  ;;  %854 = vmax.xlane.f32.xlu0 %v1928_v13 }
 0x1ca   :  { %v795_v33 = vpop.xlane.xlu0 %794  ;;  %v687_v15 = vpop.f32.mrf.mxu2 }
 0x1cb   :  { %v1933_v16 = vsub.f32 %v1800_v21, %v795_v33  ;;  %v688_v17 = vadd.f32 %v1789_v1, %v687_v15  ;;  %v1431_v20 = vpop.eup %1430 }
 0x1cc   :  { %v1943_v23 = vsel %vm761_vm0, %v1431_v20, -1e+30 }
 0x1cd   :  { %v890_v41 = vmul.f32 1.442695, %v1933_v16  ;;  %1434 = vtanh.f32 %v688_v17 }
 0x1cf   :  { %v1433_v22 = vpop.eup %1432  ;;  %1436 = vpow2.f32 %v890_v41 }
 0x1d0   :  { %v1939_v53 = vsel %vm761_vm0, %v1433_v22, -1e+30 }
 0x1d1   :  { %856 = vmax.xlane.f32.xlu1 %v1939_v53  ;;  %824 = vmax.xlane.f32.xlu0 %v1943_v23 }
 0x1d2   :  { %v797_v21 = vpop.xlane.xlu0 %796  ;;  %v689_v24 = vpop.f32.mrf.mxu2 }
 0x1d3   :  { %v1948_v27 = vsub.f32 %v1806_v29, %v797_v21  ;;  %v690_v28 = vadd.f32 %v1789_v1, %v689_v24  ;;  %v1435_v30 = vpop.eup %1434 }
 0x1d4   :  { %v1954_v34 = vsel %vm761_vm0, %v1435_v30, -1e+30 }
 0x1d5   :  { %v1437_v31 = vpop.eup %1436  ;;  %v892_v32 = vmul.f32 1.442695, %v1948_v27  ;;  %1438 = vtanh.f32 %v690_v28 }
 0x1d6   :  { %954 = vadd.xlane.f32.xlu2 %v1437_v31 }
 0x1d7   :  { %1440 = vpow2.f32 %v892_v32 }
 0x1d9   :  { %826 = vmax.xlane.f32.xlu1 %v1954_v34 }
 0x1da   :  { %v799_v42 = vpop.xlane.xlu1 %798  ;;  %v692_v54 = vpop.f32.mrf.mxu2 }
 0x1db   :  { %v1439_v37 = vpop.eup %1438  ;;  %v1958_v29 = vsub.f32 %v1814_v43, %v799_v42  ;;  %v693_v38 = vadd.f32 %v1789_v1, %v692_v54 }
 0x1dc   :  { %v1963_v39 = vsel %vm761_vm0, %v1439_v37, -1e+30 }
 0x1dd   :  { %v1441_v44 = vpop.eup %1440  ;;  %v894_v47 = vmul.f32 1.442695, %v1958_v29  ;;  %1442 = vtanh.f32 %v693_v38 }
 0x1de   :  { %956 = vadd.xlane.f32.xlu0 %v1441_v44  ;;  %828 = vmax.xlane.f32.xlu2 %v1963_v39 }
 0x1df   :  { %1444 = vpow2.f32 %v894_v47 }
 0x1e2   :  { %v801_v48 = vpop.xlane.xlu1 %800  ;;  %v694_v60 = vpop.f32.mrf.mxu2 }
 0x1e3   :  { %v1443_v49 = vpop.eup %1442  ;;  %v1968_v43 = vsub.f32 %v1820_v40, %v801_v48  ;;  %v695_v11 = vadd.f32 %v1789_v1, %v694_v60 }
 0x1e4   :  { %v1973_v50 = vsel %vm761_vm0, %v1443_v49, -1e+30 }
 0x1e5   :  { %v1445_v55 = vpop.eup %1444  ;;  %v896_v56 = vmul.f32 1.442695, %v1968_v43  ;;  %1446 = vtanh.f32 %v695_v11 }
 0x1e6   :  { %958 = vadd.xlane.f32.xlu1 %v1445_v55  ;;  %830 = vmax.xlane.f32.xlu0 %v1973_v50 }
 0x1e7   :  { %1448 = vpow2.f32 %v896_v56 }
 0x1ea   :  { %v803_v57 = vpop.xlane.xlu2 %802  ;;  %v697_v59 = vpop.f32.mrf.mxu2 }
 0x1eb   :  { %v1447_v61 = vpop.eup %1446  ;;  %v1978_v40 = vsub.f32 %v1826_v58, %v803_v57  ;;  %v698_v62 = vadd.f32 %v1789_v1, %v697_v59 }
 0x1ec   :  { %v1983_v3 = vsel %vm761_vm0, %v1447_v61, -1e+30 }
 0x1ed   :  { %v1449_v5 = vpop.eup %1448  ;;  %v898_v6 = vmul.f32 1.442695, %v1978_v40  ;;  %1450 = vtanh.f32 %v698_v62 }
 0x1ee   :  { %960 = vadd.xlane.f32.xlu2 %v1449_v5  ;;  %832 = vmax.xlane.f32.xlu1 %v1983_v3 }
 0x1ef   :  { %1452 = vpow2.f32 %v898_v6 }
 0x1f2   :  { %v805_v7 = vpop.xlane.xlu2 %804  ;;  %v699_v9 = vpop.f32.mrf.mxu2 }
 0x1f3   :  { %v1451_v12 = vpop.eup %1450  ;;  %v1988_v58 = vsub.f32 %v1832_v63, %v805_v7  ;;  %v700_v33 = vadd.f32 %v1789_v1, %v699_v9 }
 0x1f4   :  { %v1993_v15 = vsel %vm761_vm0, %v1451_v12, -1e+30 }
 0x1f5   :  { %v1453_v17 = vpop.eup %1452  ;;  %v900_v20 = vmul.f32 1.442695, %v1988_v58  ;;  %1454 = vtanh.f32 %v700_v33 }
 0x1f6   :  { %962 = vadd.xlane.f32.xlu0 %v1453_v17  ;;  %834 = vmax.xlane.f32.xlu2 %v1993_v15 }
 0x1f7   :  { %1456 = vpow2.f32 %v900_v20 }
 0x1f8   :  { %v807_v41 = vpop.xlane.xlu0 %806 }
 0x1f9   :  { %v1998_v22 = vsub.f32 %v1838_v4, %v807_v41 }
 0x1fa   :  { %v702_v63 = vpop.f32.mrf.mxu2 }
 0x1fb   :  { %v1455_v21 = vpop.eup %1454  ;;  %v902_v24 = vmul.f32 1.442695, %v1998_v22  ;;  %v703_v28 = vadd.f32 %v1789_v1, %v702_v63 }
 0x1fc   :  { %v2004_v30 = vsel %vm761_vm0, %v1455_v21, -1e+30 }
 0x1fd   :  { %v1457_v31 = vpop.eup %1456  ;;  %1458 = vpow2.f32 %v902_v24 }
 0x1fe   :  { %1460 = vtanh.f32 %v703_v28  ;;  %964 = vadd.xlane.f32.xlu1 %v1457_v31  ;;  %836 = vmax.xlane.f32.xlu0 %v2004_v30 }
 0x200   :  { %v809_v32 = vpop.xlane.xlu1 %808 }
 0x201   :  { %v2008_v4 = vsub.f32 %v1844_v8, %v809_v32 }
 0x202   :  { %v704_v42 = vpop.f32.mrf.mxu2 }
 0x203   :  { %v1459_v54 = vpop.eup %1458  ;;  %v904_v37 = vmul.f32 1.442695, %v2008_v4  ;;  %v705_v38 = vadd.f32 %v1789_v1, %v704_v42 }
 0x204   :  { %v1461_v44 = vpop.eup %1460  ;;  %966 = vadd.xlane.f32.xlu2 %v1459_v54 }
 0x205   :  { %1462 = vpow2.f32 %v904_v37  ;;  %v2014_v47 = vsel %vm761_vm0, %v1461_v44, -1e+30 }
 0x206   :  { %1464 = vtanh.f32 %v705_v38  ;;  %838 = vmax.xlane.f32.xlu1 %v2014_v47 }
 0x208   :  { %v811_v48 = vpop.xlane.xlu2 %810 }
 0x209   :  { %v2018_v8 = vsub.f32 %v1851_v14, %v811_v48 }
 0x20b   :  { %v1463_v60 = vpop.eup %1462  ;;  %v906_v49 = vmul.f32 1.442695, %v2018_v8 }
 0x20c   :  { %v1465_v11 = vpop.eup %1464  ;;  %968 = vadd.xlane.f32.xlu0 %v1463_v60  ;;  %v843_v1 = vpop.xlane.xlu0 %842 }
 0x20d   :  { %1466 = vpow2.f32 %v906_v49  ;;  %v2022_v55 = vsub.f32 %v1857_v19, %v843_v1  ;;  %v2026_v56 = vsel %vm761_vm0, %v1465_v11, -1e+30 }
 0x20e   :  { %840 = vmax.xlane.f32.xlu2 %v2026_v56 }
 0x20f   :  { %v938_v57 = vmul.f32 1.442695, %v2022_v55 }
 0x211   :  { %1468 = vpow2.f32 %v938_v57 }
 0x213   :  { %v1467_v14 = vpop.eup %1466 }
 0x214   :  { %970 = vadd.xlane.f32.xlu1 %v1467_v14  ;;  %v845_v59 = vpop.xlane.xlu1 %844  ;;  %v813_v61 = vpop.xlane.xlu0 %812 }
 0x215   :  { %v2031_v62 = vsub.f32 %v1864_v25, %v845_v59  ;;  %v2034_v5 = vsub.f32 %v1868_v26, %v813_v61 }
 0x217   :  { %v1469_v19 = vpop.eup %1468  ;;  %v940_v10 = vmul.f32 1.442695, %v2031_v62  ;;  %v908_v6 = vmul.f32 1.442695, %v2034_v5 }
 0x218   :  { %1002 = vadd.xlane.f32.xlu2 %v1469_v19 }
 0x219   :  { %1470 = vpow2.f32 %v940_v10 }
 0x21a   :  { %1472 = vpow2.f32 %v908_v6 }
 0x21c   :  { %v847_v7 = vpop.xlane.xlu2 %846  ;;  %v815_v9 = vpop.xlane.xlu1 %814 }
 0x21d   :  { %v2039_v12 = vsub.f32 %v1876_v35, %v847_v7  ;;  %v2042_v33 = vsub.f32 %v1880_v36, %v815_v9 }
 0x21f   :  { %v1471_v25 = vpop.eup %1470  ;;  %v942_v26 = vmul.f32 1.442695, %v2039_v12  ;;  %v910_v17 = vmul.f32 1.442695, %v2042_v33 }
 0x220   :  { %v1473_v20 = vpop.eup %1472  ;;  %1004 = vadd.xlane.f32.xlu0 %v1471_v25 }
 0x221   :  { %1474 = vpow2.f32 %v942_v26  ;;  %972 = vadd.xlane.f32.xlu2 %v1473_v20 }
 0x222   :  { %1476 = vpow2.f32 %v910_v17 }
 0x224   :  { %v817_v41 = vpop.xlane.xlu2 %816  ;;  %v849_v63 = vpop.xlane.xlu0 %848 }
 0x225   :  { %v2047_v21 = vsub.f32 %v1888_v45, %v817_v41  ;;  %v2050_v35 = vsub.f32 %v1892_v46, %v849_v63 }
 0x227   :  { %v1475_v36 = vpop.eup %1474  ;;  %v912_v24 = vmul.f32 1.442695, %v2047_v21  ;;  %v944_v28 = vmul.f32 1.442695, %v2050_v35 }
 0x228   :  { %v1477_v31 = vpop.eup %1476  ;;  %1006 = vadd.xlane.f32.xlu1 %v1475_v36 }
 0x229   :  { %1478 = vpow2.f32 %v912_v24  ;;  %974 = vadd.xlane.f32.xlu0 %v1477_v31 }
 0x22a   :  { %1480 = vpow2.f32 %v944_v28 }
 0x22c   :  { %v851_v32 = vpop.xlane.xlu1 %850  ;;  %v819_v42 = vpop.xlane.xlu0 %818 }
 0x22d   :  { %v2055_v54 = vsub.f32 %v1900_v51, %v851_v32  ;;  %v2058_v45 = vsub.f32 %v1904_v52, %v819_v42 }
 0x22f   :  { %v1479_v46 = vpop.eup %1478  ;;  %v946_v37 = vmul.f32 1.442695, %v2055_v54  ;;  %v914_v38 = vmul.f32 1.442695, %v2058_v45 }
 0x230   :  { %v1481_v44 = vpop.eup %1480  ;;  %976 = vadd.xlane.f32.xlu1 %v1479_v46 }
 0x231   :  { %1482 = vpow2.f32 %v946_v37  ;;  %1008 = vadd.xlane.f32.xlu2 %v1481_v44 }
 0x232   :  { %1484 = vpow2.f32 %v914_v38 }
 0x234   :  { %v2062_v48 = vpop.xlane.xlu2 %852  ;;  %v821_v60 = vpop.xlane.xlu1 %820 }
 0x235   :  { %v2065_v49 = vsub.f32 %v1916_v2, %v821_v60 }
 0x237   :  { %v1483_v51 = vpop.eup %1482  ;;  %v916_v52 = vmul.f32 1.442695, %v2065_v49 }
 0x238   :  { %v1485_v11 = vpop.eup %1484  ;;  %1010 = vadd.xlane.f32.xlu0 %v1483_v51 }
 0x239   :  { %978 = vadd.xlane.f32.xlu2 %v1485_v11  ;;  %1486 = vpow2.f32 %v916_v52 }
 0x23c   :  { %v823_v1 = vpop.xlane.xlu2 %822  ;;  %v2068_v57 = vpop.xlane.xlu0 %854 }
 0x23d   :  { %v2071_v14 = vsub.f32 %v1924_v18, %v823_v1 }
 0x23f   :  { %v918_v59 = vmul.f32 1.442695, %v2071_v14  ;;  %v1487_v61 = vpop.eup %1486 }
 0x240   :  { %980 = vadd.xlane.f32.xlu0 %v1487_v61 }
 0x241   :  { %1488 = vpow2.f32 %v918_v59 }
 0x244   :  { %v2074_v2 = vpop.xlane.xlu1 %856  ;;  %v825_v19 = vpop.xlane.xlu0 %824 }
 0x245   :  { %v2077_v10 = vsub.f32 %v1943_v23, %v825_v19 }
 0x247   :  { %v1489_v6 = vpop.eup %1488  ;;  %v920_v7 = vmul.f32 1.442695, %v2077_v10 }
 0x248   :  { %982 = vadd.xlane.f32.xlu1 %v1489_v6 }
 0x249   :  { %v955_v9 = vpop.xlane.xlu2 %954  ;;  %1490 = vpow2.f32 %v920_v7 }
 0x24a   :  { %1492 = vlog2.f32 %v955_v9 }
 0x24c   :  { %v827_v18 = vpop.xlane.xlu1 %826 }
 0x24d   :  { %v2081_v25 = vsub.f32 %v1954_v34, %v827_v18 }
 0x24f   :  { %v922_v26 = vmul.f32 1.442695, %v2081_v25  ;;  %v1491_v17 = vpop.eup %1490 }
 0x250   :  { %v1493_v20 = vpop.eup %1492  ;;  %984 = vadd.xlane.f32.xlu2 %v1491_v17 }
 0x251   :  { %1494 = vpow2.f32 %v922_v26  ;;  %v957_v41 = vpop.xlane.xlu0 %956  ;;  %v829_v63 = vpop.xlane.xlu2 %828  ;;  %v1019_v23 = vmul.f32 0.6931472, %v1493_v20 }
 0x252   :  { %1496 = vlog2.f32 %v957_v41  ;;  %v2085_v36 = vsub.f32 %v1963_v39, %v829_v63 }
 0x253   :  { %v1082_v24 = vsub.f32 %v1933_v16, %v1019_v23 }
 0x254   :  { %v924_v28 = vmul.f32 1.442695, %v2085_v36 }
 0x255   :  { %1114 = vst [vmem:[#allocation8] sm:$0xff] %v1082_v24 }
 0x256   :  { %1498 = vpow2.f32 %v924_v28 }
 0x257   :  { %v1495_v34 = vpop.eup %1494 }
 0x258   :  { %v1497_v31 = vpop.eup %1496  ;;  %986 = vadd.xlane.f32.xlu0 %v1495_v34 }
 0x259   :  { %v1021_v32 = vmul.f32 0.6931472, %v1497_v31  ;;  %v959_v42 = vpop.xlane.xlu1 %958  ;;  %v831_v46 = vpop.xlane.xlu0 %830 }
 0x25a   :  { %1500 = vlog2.f32 %v959_v42  ;;  %v2090_v37 = vsub.f32 %v1973_v50, %v831_v46 }
 0x25b   :  { %v1083_v38 = vsub.f32 %v1948_v27, %v1021_v32 }
 0x25c   :  { %v1499_v39 = vpop.eup %1498  ;;  %v926_v44 = vmul.f32 1.442695, %v2090_v37 }
 0x25d   :  { %1115 = vst [vmem:[#allocation8 + $0x8] sm:$0xff] %v1083_v38  ;;  %988 = vadd.xlane.f32.xlu1 %v1499_v39 }
 0x25e   :  { %1502 = vpow2.f32 %v926_v44 }
 0x260   :  { %v1501_v16 = vpop.eup %1500 }
 0x261   :  { %v1023_v60 = vmul.f32 0.6931472, %v1501_v16  ;;  %v961_v51 = vpop.xlane.xlu2 %960  ;;  %v833_v52 = vpop.xlane.xlu1 %832 }
 0x262   :  { %1504 = vlog2.f32 %v961_v51  ;;  %v2095_v11 = vsub.f32 %v1983_v3, %v833_v52  ;;  %v2131_v52 = vsub.f32 %v1912_v0, %v2062_v48 }
 0x263   :  { %v1084_v1 = vsub.f32 %v1958_v29, %v1023_v60 }
 0x264   :  { %v1503_v50 = vpop.eup %1502  ;;  %v928_v59 = vmul.f32 1.442695, %v2095_v11 }
 0x265   :  { %1116 = vst [vmem:[#allocation8 + $0x10] sm:$0xff] %v1084_v1  ;;  %990 = vadd.xlane.f32.xlu2 %v1503_v50  ;;  %v948_v50 = vmul.f32 1.442695, %v2131_v52 }
 0x266   :  { %1506 = vpow2.f32 %v928_v59 }
 0x268   :  { %v1505_v27 = vpop.eup %1504 }
 0x269   :  { %v1025_v61 = vmul.f32 0.6931472, %v1505_v27  ;;  %v963_v19 = vpop.xlane.xlu0 %962  ;;  %v835_v6 = vpop.xlane.xlu2 %834 }
 0x26a   :  { %1508 = vlog2.f32 %v963_v19  ;;  %v2100_v7 = vsub.f32 %v1993_v15, %v835_v6 }
 0x26b   :  { %v1085_v9 = vsub.f32 %v1968_v43, %v1025_v61  ;;  %v2111_v43 = vsub.f32 %v1928_v13, %v2068_v57  ;;  %v2121_v13 = vsub.f32 %v1939_v53, %v2074_v2 }
 0x26c   :  { %v1507_v3 = vpop.eup %1506  ;;  %v930_v18 = vmul.f32 1.442695, %v2100_v7 }
 0x26d   :  { %1117 = vst [vmem:[#allocation8 + $0x18] sm:$0xff] %v1085_v9  ;;  %992 = vadd.xlane.f32.xlu0 %v1507_v3  ;;  %v950_v34 = vmul.f32 1.442695, %v2111_v43 }
 0x26e   :  { %1510 = vpow2.f32 %v930_v18 }
 0x270   :  { %v1509_v29 = vpop.eup %1508 }
 0x271   :  { %v1027_v26 = vmul.f32 0.6931472, %v1509_v29  ;;  %v965_v17 = vpop.xlane.xlu1 %964  ;;  %v837_v20 = vpop.xlane.xlu0 %836 }
 0x272   :  { %1512 = vlog2.f32 %v965_v17  ;;  %v2105_v41 = vsub.f32 %v2004_v30, %v837_v20 }
 0x273   :  { %v1086_v63 = vsub.f32 %v1978_v40, %v1027_v26 }
 0x274   :  { %v1511_v15 = vpop.eup %1510  ;;  %v932_v23 = vmul.f32 1.442695, %v2105_v41 }
 0x275   :  { %1118 = vst [vmem:[#allocation8 + $0x20] sm:$0xff] %v1086_v63  ;;  %994 = vadd.xlane.f32.xlu1 %v1511_v15 }
 0x276   :  { %1514 = vpow2.f32 %v932_v23 }
 0x277   :  { %v967_v24 = vpop.xlane.xlu2 %966 }
 0x278   :  { %v1513_v28 = vpop.eup %1512  ;;  %1516 = vlog2.f32 %v967_v24 }
 0x279   :  { %v1029_v31 = vmul.f32 0.6931472, %v1513_v28  ;;  %v839_v30 = vpop.xlane.xlu1 %838  ;;  %1518 = vpow2.f32 %v950_v34 }
 0x27a   :  { %v2115_v32 = vsub.f32 %v2014_v47, %v839_v30  ;;  %v952_v47 = vmul.f32 1.442695, %v2121_v13 }
 0x27b   :  { %v1087_v40 = vsub.f32 %v1988_v58, %v1029_v31 }
 0x27c   :  { %v1515_v42 = vpop.eup %1514  ;;  %v934_v46 = vmul.f32 1.442695, %v2115_v32 }
 0x27d   :  { %1119 = vst [vmem:[#allocation8 + $0x28] sm:$0xff] %v1087_v40  ;;  %996 = vadd.xlane.f32.xlu2 %v1515_v42 }
 0x27e   :  { %v1517_v57 = vpop.eup %1516  ;;  %1520 = vpow2.f32 %v934_v46 }
 0x27f   :  { %v1031_v38 = vmul.f32 0.6931472, %v1517_v57  ;;  %v969_v39 = vpop.xlane.xlu0 %968  ;;  %v1519_v60 = vpop.eup %1518 }
 0x280   :  { %1522 = vlog2.f32 %v969_v39 }
 0x281   :  { %v1088_v44 = vsub.f32 %v1998_v22, %v1031_v38  ;;  %v841_v58 = vpop.xlane.xlu2 %840  ;;  %1524 = vpow2.f32 %v952_v47 }
 0x282   :  { %v2126_v16 = vsub.f32 %v2026_v56, %v841_v58 }
 0x283   :  { %1120 = vst [vmem:[#allocation8 + $0x30] sm:$0xff] %v1088_v44 }
 0x284   :  { %v1521_v51 = vpop.eup %1520  ;;  %v936_v53 = vmul.f32 1.442695, %v2126_v16 }
 0x285   :  { %998 = vadd.xlane.f32.xlu0 %v1521_v51  ;;  %1014 = vadd.xlane.f32.xlu2 %v1519_v60 }
 0x286   :  { %v1523_v2 = vpop.eup %1522  ;;  %1526 = vpow2.f32 %v936_v53 }
 0x287   :  { %v1033_v1 = vmul.f32 0.6931472, %v1523_v2  ;;  %v971_v22 = vpop.xlane.xlu1 %970  ;;  %v1525_v59 = vpop.eup %1524 }
 0x288   :  { %1528 = vlog2.f32 %v971_v22 }
 0x289   :  { %v1089_v56 = vsub.f32 %v2008_v4, %v1033_v1 }
 0x28b   :  { %1121 = vst [vmem:[#allocation8 + $0x38] sm:$0xff] %v1089_v56  ;;  %v1003_v27 = vpop.xlane.xlu2 %1002 }
 0x28c   :  { %v1527_v61 = vpop.eup %1526  ;;  %1530 = vlog2.f32 %v1003_v27 }
 0x28d   :  { %1016 = vadd.xlane.f32.xlu0 %v1525_v59  ;;  %1000 = vadd.xlane.f32.xlu1 %v1527_v61  ;;  %1532 = vpow2.f32 %v948_v50 }
 0x28e   :  { %v1529_v19 = vpop.eup %1528 }
 0x28f   :  { %v1035_v6 = vmul.f32 0.6931472, %v1529_v19 }
 0x291   :  { %v1090_v0 = vsub.f32 %v2018_v8, %v1035_v6 }
 0x292   :  { %v1531_v48 = vpop.eup %1530 }
 0x293   :  { %1122 = vst [vmem:[#allocation8 + $0x40] sm:$0xff] %v1090_v0  ;;  %v1067_v9 = vmul.f32 0.6931472, %v1531_v48  ;;  %v1005_v3 = vpop.xlane.xlu0 %1004  ;;  %v1533_v18 = vpop.eup %1532 }
 0x294   :  { %v973_v4 = vpop.xlane.xlu2 %972  ;;  %1534 = vlog2.f32 %v1005_v3 }
 0x295   :  { %v1106_v29 = vsub.f32 %v2022_v55, %v1067_v9  ;;  %1536 = vlog2.f32 %v973_v4  ;;  %1012 = vadd.xlane.f32.xlu1 %v1533_v18 }
 0x297   :  { %1138 = vst [vmem:[#allocation8 + $0xc0] sm:$0xff] %v1106_v29 }
 0x29a   :  { %v1535_v26 = vpop.eup %1534 }
 0x29b   :  { %v1537_v17 = vpop.eup %1536  ;;  %v1069_v20 = vmul.f32 0.6931472, %v1535_v26  ;;  %v1007_v63 = vpop.xlane.xlu1 %1006 }
 0x29c   :  { %v1037_v15 = vmul.f32 0.6931472, %v1537_v17  ;;  %1538 = vlog2.f32 %v1007_v63  ;;  %v975_v23 = vpop.xlane.xlu0 %974 }
 0x29d   :  { %v1107_v8 = vsub.f32 %v2031_v62, %v1069_v20  ;;  %1540 = vlog2.f32 %v975_v23 }
 0x29e   :  { %v1091_v24 = vsub.f32 %v2034_v5, %v1037_v15 }
 0x29f   :  { %1139 = vst [vmem:[#allocation8 + $0xc8] sm:$0xff] %v1107_v8 }
 0x2a0   :  { %1123 = vst [vmem:[#allocation8 + $0x48] sm:$0xff] %v1091_v24 }
 0x2a2   :  { %v1539_v28 = vpop.eup %1538 }
 0x2a3   :  { %v1541_v34 = vpop.eup %1540  ;;  %v1071_v55 = vmul.f32 0.6931472, %v1539_v28  ;;  %v977_v31 = vpop.xlane.xlu1 %976 }
 0x2a4   :  { %v1039_v30 = vmul.f32 0.6931472, %v1541_v34  ;;  %1542 = vlog2.f32 %v977_v31  ;;  %v1009_v40 = vpop.xlane.xlu2 %1008 }
 0x2a5   :  { %v1108_v42 = vsub.f32 %v2039_v12, %v1071_v55  ;;  %1544 = vlog2.f32 %v1009_v40 }
 0x2a6   :  { %v1092_v46 = vsub.f32 %v2042_v33, %v1039_v30 }
 0x2a7   :  { %1140 = vst [vmem:[#allocation8 + $0xd0] sm:$0xff] %v1108_v42 }
 0x2a8   :  { %1124 = vst [vmem:[#allocation8 + $0x50] sm:$0xff] %v1092_v46 }
 0x2aa   :  { %v1543_v62 = vpop.eup %1542 }
 0x2ab   :  { %v1545_v57 = vpop.eup %1544  ;;  %v1041_v38 = vmul.f32 0.6931472, %v1543_v62  ;;  %v1011_v5 = vpop.xlane.xlu0 %1010 }
 0x2ac   :  { %v1073_v39 = vmul.f32 0.6931472, %v1545_v57  ;;  %v979_v47 = vpop.xlane.xlu2 %978  ;;  %1546 = vlog2.f32 %v1011_v5 }
 0x2ad   :  { %v1093_v44 = vsub.f32 %v2047_v21, %v1041_v38  ;;  %1548 = vlog2.f32 %v979_v47 }
 0x2ae   :  { %v1109_v58 = vsub.f32 %v2050_v35, %v1073_v39 }
 0x2af   :  { %1125 = vst [vmem:[#allocation8 + $0x58] sm:$0xff] %v1093_v44 }
 0x2b0   :  { %1141 = vst [vmem:[#allocation8 + $0xd8] sm:$0xff] %v1109_v58 }
 0x2b2   :  { %v1547_v12 = vpop.eup %1546 }
 0x2b3   :  { %v1549_v60 = vpop.eup %1548  ;;  %v1075_v51 = vmul.f32 0.6931472, %v1547_v12  ;;  %v981_v53 = vpop.xlane.xlu0 %980 }
 0x2b4   :  { %v1043_v33 = vmul.f32 0.6931472, %v1549_v60  ;;  %1550 = vlog2.f32 %v981_v53 }
 0x2b5   :  { %v1110_v2 = vsub.f32 %v2055_v54, %v1075_v51 }
 0x2b6   :  { %v1094_v1 = vsub.f32 %v2058_v45, %v1043_v33 }
 0x2b7   :  { %1142 = vst [vmem:[#allocation8 + $0xe0] sm:$0xff] %v1110_v2 }
 0x2b8   :  { %1126 = vst [vmem:[#allocation8 + $0x60] sm:$0xff] %v1094_v1 }
 0x2ba   :  { %v1551_v22 = vpop.eup %1550 }
 0x2bb   :  { %v983_v56 = vpop.xlane.xlu1 %982  ;;  %v1045_v21 = vmul.f32 0.6931472, %v1551_v22 }
 0x2bc   :  { %1552 = vlog2.f32 %v983_v56 }
 0x2bd   :  { %v1095_v35 = vsub.f32 %v2065_v49, %v1045_v21 }
 0x2bf   :  { %1127 = vst [vmem:[#allocation8 + $0x68] sm:$0xff] %v1095_v35 }
 0x2c2   :  { %v1553_v50 = vpop.eup %1552 }
 0x2c3   :  { %v1047_v59 = vmul.f32 0.6931472, %v1553_v50  ;;  %v985_v27 = vpop.xlane.xlu2 %984 }
 0x2c4   :  { %1554 = vlog2.f32 %v985_v27 }
 0x2c5   :  { %v1096_v61 = vsub.f32 %v2071_v14, %v1047_v59 }
 0x2c7   :  { %1128 = vst [vmem:[#allocation8 + $0x70] sm:$0xff] %v1096_v61 }
 0x2ca   :  { %v1555_v54 = vpop.eup %1554 }
 0x2cb   :  { %v987_v19 = vpop.xlane.xlu0 %986  ;;  %v1049_v6 = vmul.f32 0.6931472, %v1555_v54 }
 0x2cc   :  { %1556 = vlog2.f32 %v987_v19 }
 0x2cd   :  { %v1097_v45 = vsub.f32 %v2077_v10, %v1049_v6 }
 0x2cf   :  { %1129 = vst [vmem:[#allocation8 + $0x78] sm:$0xff] %v1097_v45 }
 0x2d0   :  { %v989_v0 = vpop.xlane.xlu1 %988 }
 0x2d1   :  { %1558 = vlog2.f32 %v989_v0 }
 0x2d2   :  { %v1557_v48 = vpop.eup %1556 }
 0x2d3   :  { %v1051_v9 = vmul.f32 0.6931472, %v1557_v48 }
 0x2d5   :  { %v1098_v49 = vsub.f32 %v2081_v25, %v1051_v9 }
 0x2d7   :  { %v1559_v3 = vpop.eup %1558  ;;  %1130 = vst [vmem:[#allocation8 + $0x80] sm:$0xff] %v1098_v49 }
 0x2d8   :  { %v1053_v18 = vmul.f32 0.6931472, %v1559_v3  ;;  %v991_v4 = vpop.xlane.xlu2 %990 }
 0x2d9   :  { %1560 = vlog2.f32 %v991_v4 }
 0x2da   :  { %v1099_v14 = vsub.f32 %v2085_v36, %v1053_v18 }
 0x2dc   :  { %1131 = vst [vmem:[#allocation8 + $0x88] sm:$0xff] %v1099_v14 }
 0x2df   :  { %v1561_v29 = vpop.eup %1560 }
 0x2e0   :  { %v1055_v26 = vmul.f32 0.6931472, %v1561_v29  ;;  %v993_v17 = vpop.xlane.xlu0 %992 }
 0x2e1   :  { %1562 = vlog2.f32 %v993_v17 }
 0x2e2   :  { %v1100_v10 = vsub.f32 %v2090_v37, %v1055_v26 }
 0x2e4   :  { %1132 = vst [vmem:[#allocation8 + $0x90] sm:$0xff] %v1100_v10 }
 0x2e7   :  { %v1563_v20 = vpop.eup %1562 }
 0x2e8   :  { %v1057_v63 = vmul.f32 0.6931472, %v1563_v20  ;;  %v995_v15 = vpop.xlane.xlu1 %994 }
 0x2e9   :  { %1564 = vlog2.f32 %v995_v15 }
 0x2ea   :  { %v1101_v25 = vsub.f32 %v2095_v11, %v1057_v63 }
 0x2ec   :  { %1133 = vst [vmem:[#allocation8 + $0x98] sm:$0xff] %v1101_v25 }
 0x2ef   :  { %v1565_v23 = vpop.eup %1564 }
 0x2f0   :  { %v1059_v8 = vmul.f32 0.6931472, %v1565_v23  ;;  %v997_v24 = vpop.xlane.xlu2 %996 }
 0x2f1   :  { %1566 = vlog2.f32 %v997_v24 }
 0x2f2   :  { %v1102_v36 = vsub.f32 %v2100_v7, %v1059_v8 }
 0x2f4   :  { %1134 = vst [vmem:[#allocation8 + $0xa0] sm:$0xff] %v1102_v36 }
 0x2f7   :  { %v1567_v28 = vpop.eup %1566 }
 0x2f8   :  { %v1061_v34 = vmul.f32 0.6931472, %v1567_v28  ;;  %v1015_v55 = vpop.xlane.xlu2 %1014  ;;  %v999_v31 = vpop.xlane.xlu0 %998 }
 0x2f9   :  { %1568 = vlog2.f32 %v1015_v55 }
 0x2fa   :  { %v1103_v37 = vsub.f32 %v2105_v41, %v1061_v34  ;;  %1570 = vlog2.f32 %v999_v31 }
 0x2fc   :  { %1135 = vst [vmem:[#allocation8 + $0xa8] sm:$0xff] %v1103_v37 }
 0x2ff   :  { %v1569_v30 = vpop.eup %1568 }
 0x300   :  { %v1571_v40 = vpop.eup %1570  ;;  %v1079_v11 = vmul.f32 0.6931472, %v1569_v30  ;;  %v1001_v42 = vpop.xlane.xlu1 %1000 }
 0x301   :  { %v1017_v46 = vpop.xlane.xlu0 %1016  ;;  %v1063_v62 = vmul.f32 0.6931472, %v1571_v40  ;;  %1572 = vlog2.f32 %v1001_v42 }
 0x302   :  { %v1112_v57 = vsub.f32 %v2111_v43, %v1079_v11  ;;  %1574 = vlog2.f32 %v1017_v46 }
 0x303   :  { %v1104_v7 = vsub.f32 %v2115_v32, %v1063_v62 }
 0x304   :  { %1144 = vst [vmem:[#allocation8 + $0xf0] sm:$0xff] %v1112_v57 }
 0x305   :  { %1136 = vst [vmem:[#allocation8 + $0xb0] sm:$0xff] %v1104_v7 }
 0x307   :  { %v1573_v38 = vpop.eup %1572 }
 0x308   :  { %v1575_v5 = vpop.eup %1574  ;;  %v1065_v39 = vmul.f32 0.6931472, %v1573_v38  ;;  %v1013_v41 = vpop.xlane.xlu1 %1012 }
 0x309   :  { %v1081_v47 = vmul.f32 0.6931472, %v1575_v5  ;;  %1576 = vlog2.f32 %v1013_v41 }
 0x30a   :  { %v1105_v44 = vsub.f32 %v2126_v16, %v1065_v39 }
 0x30b   :  { %v1113_v58 = vsub.f32 %v2121_v13, %v1081_v47 }
 0x30c   :  { %1137 = vst [vmem:[#allocation8 + $0xb8] sm:$0xff] %v1105_v44 }
 0x30d   :  { %1145 = vst [vmem:[#allocation8 + $0xf8] sm:$0xff] %v1113_v58 }
 0x30f   :  { %v1577_v43 = vpop.eup %1576 }
 0x310   :  { %v1077_v32 = vmul.f32 0.6931472, %v1577_v43 }
 0x312   :  { %v1111_v12 = vsub.f32 %v2131_v52, %v1077_v32 }
 0x314   :  { %1143 = vst [vmem:[#allocation8 + $0xe8] sm:$0xff] %v1111_v12 }
 0x315   :  { %1158 = dma.vmem_to_hbm [thread:$0]  %s1151_s12, 4096, %s1153_s15, [#allocation4], %s1688_s16, %s1688_s16, %s1689_s17  }
 0x316   :  { %1678 = dma.done.wait [#allocation4], 4096  }
 0x317   :  { %1679 = vsyncadd [#allocation4], 4294963200 }
 0x318   :  { %1163 = vsyncpa [#allocation3], 1 }
 0x319   :  { %1164 = vsyncpa [#allocation6], 1 }
 0x31a   :  { %1165 = vsyncpa [#allocation4], 1 }

</bundles_post_ra>
